<compile_context>
chip_gen: v6e
topology: v6e:2x2x1
jax: 0.10.0
libtpu: 0.0.40
codegen_flags: <defaults>
</compile_context>

<pallas_src>
import numpy as np
import jax
import jax.numpy as jnp
from jax.experimental import pallas as pl
from jax.experimental.pallas import tpu as pltpu

LANE = 128  # per-kh lane pitch of the conv patches / banded weights


# ----------------------------- fused Pallas kernel ------------------------- #

def _make_kernel(H, C1, C2, NCLS):
    H2, H4 = H // 2, H // 4                  # 14, 7
    G = H4                                   # rows per mod-4 group / pooled slab (7)
    RP = ((H + 2 + 7) // 8) * 8              # 8-aligned padded-row pitch (32)
    SL = RP // 4                             # rows per mod-4 slab (8)
    assert SL >= G + 1
    f32, bf16 = jnp.float32, jnp.bfloat16

    def kernel(a1_ref, w1e_ref, w1o_ref, b1_ref, w2e_ref, w2o_ref, b2_ref,
               wf_ref, bf_ref, out_ref, e_ref, o_ref):
        # a1_ref block: (1, RP, 128) f32.  Row m*SL + k holds padded image row 4k+m.
        x = a1_ref[0]
        S = [x[SL * m: SL * m + SL, :] for m in range(4)]      # (8, 128) each

        def patch(parts):            # 128-lane-aligned concat -> bf16 MXU operand
            return jnp.concatenate(parts, axis=1).astype(bf16)

        def conv(p, we_ref, wo_ref):  # banded conv, W-pool folded in (even/odd bands)
            return jnp.maximum(
                jnp.dot(p, we_ref[...], preferred_element_type=f32),
                jnp.dot(p, wo_ref[...], preferred_element_type=f32))

        # ---- conv1 + bias + ReLU6 + 2x2 max-pool -------------------------------
        # Output rows h = 4k+m; pool pairs rows (4k, 4k+1) and (4k+2, 4k+3), i.e.
        # groups (m=0, m=1) and (m=2, m=3) -> plain full-tile maxima.
        p0 = patch([S[0][0:G], S[1][0:G], S[2][0:G]])           # h = 4k
        p1 = patch([S[1][0:G], S[2][0:G], S[3][0:G]])           # h = 4k+1
        p2 = patch([S[2][0:G], S[3][0:G], S[0][1:G + 1]])       # h = 4k+2
        p3 = patch([S[3][0:G], S[0][1:G + 1], S[1][1:G + 1]])   # h = 4k+3
        pool1_even = jnp.clip(jnp.maximum(conv(p0, w1e_ref, w1o_ref),
                                          conv(p1, w1e_ref, w1o_ref))
                              + b1_ref[...], 0.0, 6.0)          # pooled rows 0,2,..,12
        pool1_odd = jnp.clip(jnp.maximum(conv(p2, w1e_ref, w1o_ref),
                                         conv(p3, w1e_ref, w1o_ref))
                             + b1_ref[...], 0.0, 6.0)           # pooled rows 1,3,..,13

        # ---- zero-padded pooled map, split by padded-row parity (VMEM scratch) --
        # e_ref row i = padded pooled row 2i   = pooled row 2i-1 (row 0 = top pad)
        # o_ref row i = padded pooled row 2i+1 = pooled row 2i   (row G = bottom pad)
        e_ref[...] = jnp.zeros_like(e_ref)
        o_ref[...] = jnp.zeros_like(o_ref)
        e_ref[1:G + 1, 0:H2 * C1] = pool1_odd
        o_ref[0:G, 0:H2 * C1] = pool1_even
        E = e_ref[...]
        O = o_ref[...]                                          # (8, 128) f32

        # ---- conv2 + bias + ReLU6 + 2x2 max-pool ---------------------------------
        qe = patch([E[0:G], O[0:G], E[1:G + 1]])                # output rows h = 2i
        qo = patch([O[0:G], E[1:G + 1], O[1:G + 1]])            # output rows h = 2i+1
        pool2 = jnp.clip(jnp.maximum(conv(qe, w2e_ref, w2o_ref),
                                     conv(qo, w2e_ref, w2o_ref))
                         + b2_ref[...], 0.0, 6.0)               # (7, 7*16) = (7, 112)

        # ---- flatten ((h, w, c) order; fc1 weight pre-permuted) + fc1 ------------
        p2b = pool2.astype(bf16)
        flat = jnp.concatenate([p2b[i:i + 1, :] for i in range(H4)], axis=1)  # (1,784)
        out_ref[0] = (jnp.dot(flat, wf_ref[...], preferred_element_type=f32)
                      + bf_ref[...])

    scratch = [pltpu.VMEM((H4 + 1, LANE), jnp.float32),
               pltpu.VMEM((H4 + 1, LANE), jnp.float32)]
    return kernel, scratch


# ------------------------- host-side parameter repack ----------------------- #

def prepare_params(params, H=28):
    """One-time repack of PyTorch-layout weights for the fused kernel."""
    conv1_w = np.asarray(params["conv1_w"], np.float32)   # (C1, Cin, 3, 3)
    conv2_w = np.asarray(params["conv2_w"], np.float32)   # (C2, C1, 3, 3)
    C1 = conv1_w.shape[0]
    C2 = conv2_w.shape[0]
    fc1_w = np.asarray(params["fc1_w"], np.float32)
    NCLS = fc1_w.shape[0]
    H2, H4 = H // 2, H // 4

    def band(w_oihw, wouts, n_win, pad):
        # Banded conv-as-matmul weight:
        #   rows = (kh, w_in, cin) with a 128-lane pitch per kh block (K = 3*128)
        #   cols = (j, cout) for output columns w_out = wouts[j]
        # pad = 0: patch lanes already hold zero-padded columns (conv1)
        # pad = 1: patch lanes hold unpadded columns; out-of-range taps dropped (conv2)
        w = np.asarray(w_oihw, np.float32)
        co, ci = w.shape[0], w.shape[1]
        wt = np.transpose(w, (2, 3, 1, 0))                  # (kh, kw, ci, co)
        out = np.zeros((3 * LANE, len(wouts) * co), np.float32)
        for kh in range(3):
            for kw in range(3):
                for j, wo in enumerate(wouts):
                    win = wo + kw - pad
                    if 0 <= win < n_win:
                        r = kh * LANE + win * ci
                        out[r:r + ci, j * co:(j + 1) * co] = wt[kh, kw]
        return jnp.asarray(out, jnp.bfloat16)

    # fc1 weight: PyTorch flatten order is (c, h, w) -> re-order rows to (h, w, c).
    wf = fc1_w.reshape(NCLS, C2, H4, H4).transpose(2, 3, 1, 0).reshape(H4 * H4 * C2, NCLS)

    return {
        "w1e": band(conv1_w, list(range(0, H, 2)), H + 2, 0),   # (384, 112) bf16
        "w1o": band(conv1_w, list(range(1, H, 2)), H + 2, 0),
        "b1": jnp.asarray(np.tile(np.asarray(params["conv1_b"], np.float32), H2)[None, :]),
        "w2e": band(conv2_w, list(range(0, H2, 2)), H2, 1),     # (384, 112) bf16
        "w2o": band(conv2_w, list(range(1, H2, 2)), H2, 1),
        "b2": jnp.asarray(np.tile(np.asarray(params["conv2_b"], np.float32), H4)[None, :]),
        "wf": jnp.asarray(wf, jnp.bfloat16),                    # (784, 10) bf16
        "bf": jnp.asarray(np.asarray(params["fc1_b"], np.float32)[None, :]),
    }


# --------------------------------- forward ---------------------------------- #

@jax.jit
def simple_cnn2d_forward(x_nchw, prep):
    B, Cin, H, W = x_nchw.shape
    H2, H4 = H // 2, H // 4
    C1 = prep["b1"].shape[1] // H2
    C2 = prep["b2"].shape[1] // H4
    NCLS = prep["bf"].shape[1]
    Hp = H + 2
    RP = ((Hp + 7) // 8) * 8
    assert H == W and H % 4 == 0
    assert Hp * Cin <= LANE and H2 * C1 <= LANE and H4 * C2 <= LANE

    # NCHW -> NHWC -> zero-pad spatial -> lane-pad each padded row (90 -> 128),
    # 8-aligned per-image row pitch (30 -> 32), then de-interleave rows mod 4
    # (block row m*(RP/4) + k holds padded image row 4k + m) so the in-kernel
    # H-direction pooling needs no strided / per-row ops.
    x = jnp.transpose(x_nchw, (0, 2, 3, 1)).astype(jnp.float32)
    xp = jnp.pad(x, ((0, 0), (1, 1), (1, 1), (0, 0)))                   # (B,30,30,Cin)
    a1 = xp.reshape(B, Hp, Hp * Cin)
    a1 = jnp.pad(a1, ((0, 0), (0, RP - Hp), (0, LANE - Hp * Cin)))      # (B,32,128)
    a1 = a1.reshape(B, RP // 4, 4, LANE).transpose(0, 2, 1, 3).reshape(B, RP, LANE)

    kernel, scratch = _make_kernel(H, C1, C2, NCLS)

    flops = int(2 * B * (2 * H * (3 * LANE) * (H2 * C1)
                         + 2 * H2 * (3 * LANE) * (H4 * C2)
                         + (H4 * H4 * C2) * NCLS))
    bytes_acc = int(a1.size * 4 + B * NCLS * 4
                    + sum(int(prep[k].size) * prep[k].dtype.itemsize
                          for k in ("w1e", "w1o", "b1", "w2e", "w2o", "b2", "wf", "bf")))

    out = pl.pallas_call(
        kernel,
        out_shape=jax.ShapeDtypeStruct((B, 1, NCLS), jnp.float32),
        grid=(B,),
        in_specs=[
            pl.BlockSpec((1, RP, LANE), lambda b: (b, 0, 0)),
            pl.BlockSpec(prep["w1e"].shape, lambda b: (0, 0)),
            pl.BlockSpec(prep["w1o"].shape, lambda b: (0, 0)),
            pl.BlockSpec(prep["b1"].shape, lambda b: (0, 0)),
            pl.BlockSpec(prep["w2e"].shape, lambda b: (0, 0)),
            pl.BlockSpec(prep["w2o"].shape, lambda b: (0, 0)),
            pl.BlockSpec(prep["b2"].shape, lambda b: (0, 0)),
            pl.BlockSpec(prep["wf"].shape, lambda b: (0, 0)),
            pl.BlockSpec(prep["bf"].shape, lambda b: (0, 0)),
        ],
        out_specs=pl.BlockSpec((1, 1, NCLS), lambda b: (b, 0, 0)),
        scratch_shapes=scratch,
        compiler_params=pltpu.CompilerParams(dimension_semantics=("parallel",)),
        cost_estimate=pl.CostEstimate(flops=flops, transcendentals=0,
                                      bytes_accessed=bytes_acc),
    )(a1, prep["w1e"], prep["w1o"], prep["b1"], prep["w2e"], prep["w2o"],
      prep["b2"], prep["wf"], prep["bf"])
    return out.reshape(B, NCLS)


# ------------------------ deterministic parameters -------------------------- #

def init_params(key, in_channels=3, num_classes=10):
    k = jax.random.split(key, 6)
    return {
        "conv1_w": 0.10 * jax.random.normal(k[0], (8, in_channels, 3, 3), jnp.float32),
        "conv1_b": 0.10 * jax.random.normal(k[1], (8,), jnp.float32),
        "conv2_w": 0.10 * jax.random.normal(k[2], (16, 8, 3, 3), jnp.float32),
        "conv2_b": 0.10 * jax.random.normal(k[3], (16,), jnp.float32),
        "fc1_w":   0.05 * jax.random.normal(k[4], (num_classes, 16 * 7 * 7), jnp.float32),
        "fc1_b":   0.05 * jax.random.normal(k[5], (num_classes,), jnp.float32),
    }


# ------------------------------ pure-JAX reference -------------------------- #

def reference_forward(x, params):
    def conv(a, w, b):
        y = jax.lax.conv_general_dilated(
            a, w, window_strides=(1, 1), padding=((1, 1), (1, 1)),
            dimension_numbers=("NCHW", "OIHW", "NCHW"))
        return y + b.reshape(1, -1, 1, 1)

    def relu6(a):
        return jnp.clip(a, 0.0, 6.0)

    def pool(a):
        return jax.lax.reduce_window(a, -jnp.inf, jax.lax.max,
                                     (1, 1, 2, 2), (1, 1, 2, 2), "VALID")

    h = pool(relu6(conv(x, params["conv1_w"], params["conv1_b"])))
    h = pool(relu6(conv(h, params["conv2_w"], params["conv2_b"])))
    h = h.reshape(h.shape[0], -1)
    return h @ params["fc1_w"].T + params["fc1_b"]


# ----------------------------------- main ------------------------------------ #

if __name__ == "__main__":
    key = jax.random.PRNGKey(0)
    pkey, xkey = jax.random.split(key)
    params = init_params(pkey, in_channels=3, num_classes=10)

    # fc1 = Linear(16*7*7, 10) forces 28x28 spatial input.
    x = jax.random.normal(xkey, (2, 3, 28, 28), jnp.float32)   # NCHW

    prep = prepare_params(params, H=28)
    out = jax.block_until_ready(simple_cnn2d_forward(x, prep))
    assert out.shape == (2, 10)

    ref = jax.block_until_ready(reference_forward(x, params))
    # bf16 MXU operands (f32 accumulation / f32 VPU math) -> slightly looser tolerance
    # than the pure-f32 version; a structural bug would be orders of magnitude larger.
    err = np.max(np.abs(np.asarray(out) - np.asarray(ref)))
    assert np.allclose(np.asarray(out), np.asarray(ref), atol=2.5e-2, rtol=1e-2), err

    print("KERNEL_OK")
</pallas_src>

<mosaic_0001>
module attributes {stable_mosaic.version = 11 : i64} {
  func.func @kernel(%arg0: i32, %arg1: memref<1x32x128xf32, #tpu.memory_space<vmem>>, %arg2: memref<384x112xbf16, #tpu.memory_space<vmem>>, %arg3: memref<384x112xbf16, #tpu.memory_space<vmem>>, %arg4: memref<1x112xf32, #tpu.memory_space<vmem>>, %arg5: memref<384x112xbf16, #tpu.memory_space<vmem>>, %arg6: memref<384x112xbf16, #tpu.memory_space<vmem>>, %arg7: memref<1x112xf32, #tpu.memory_space<vmem>>, %arg8: memref<784x10xbf16, #tpu.memory_space<vmem>>, %arg9: memref<1x10xf32, #tpu.memory_space<vmem>>, %arg10: memref<1x1x10xf32, #tpu.memory_space<vmem>>, %arg11: memref<8x128xf32, #tpu.memory_space<vmem>>, %arg12: memref<8x128xf32, #tpu.memory_space<vmem>>) attributes {dimension_semantics = [#tpu.dimension_semantics<parallel>], iteration_bounds = array<i64: 2>, scalar_prefetch = 0 : i64, scratch_operands = 2 : i64, tpu.core_type = #tpu.core_type<tc>, window_params = [{transform_indices = @transform_0, window_bounds = array<i64: 1, 32, 128>}, {pipeline_mode = #tpu.pipeline_mode<synchronous>, transform_indices = @transform_1, window_bounds = array<i64: 384, 112>}, {pipeline_mode = #tpu.pipeline_mode<synchronous>, transform_indices = @transform_2, window_bounds = array<i64: 384, 112>}, {pipeline_mode = #tpu.pipeline_mode<synchronous>, transform_indices = @transform_3, window_bounds = array<i64: 1, 112>}, {pipeline_mode = #tpu.pipeline_mode<synchronous>, transform_indices = @transform_4, window_bounds = array<i64: 384, 112>}, {pipeline_mode = #tpu.pipeline_mode<synchronous>, transform_indices = @transform_5, window_bounds = array<i64: 384, 112>}, {pipeline_mode = #tpu.pipeline_mode<synchronous>, transform_indices = @transform_6, window_bounds = array<i64: 1, 112>}, {pipeline_mode = #tpu.pipeline_mode<synchronous>, transform_indices = @transform_7, window_bounds = array<i64: 784, 10>}, {pipeline_mode = #tpu.pipeline_mode<synchronous>, transform_indices = @transform_8, window_bounds = array<i64: 1, 10>}, {transform_indices = @transform_9, window_bounds = array<i64: 1, 1, 10>}]} {
    %c0 = arith.constant 0 : index
    %c0_0 = arith.constant 0 : index
    %c0_1 = arith.constant 0 : index
    %0 = vector.load %arg1[%c0, %c0_0, %c0_1] : memref<1x32x128xf32, #tpu.memory_space<vmem>>, vector<1x32x128xf32>
    %1 = vector.shape_cast %0 : vector<1x32x128xf32> to vector<32x128xf32>
    %2 = vector.extract_strided_slice %1 {offsets = [0, 0], sizes = [8, 128], strides = [1, 1]} : vector<32x128xf32> to vector<8x128xf32>
    %3 = vector.extract_strided_slice %1 {offsets = [8, 0], sizes = [8, 128], strides = [1, 1]} : vector<32x128xf32> to vector<8x128xf32>
    %4 = vector.extract_strided_slice %1 {offsets = [16, 0], sizes = [8, 128], strides = [1, 1]} : vector<32x128xf32> to vector<8x128xf32>
    %5 = vector.extract_strided_slice %1 {offsets = [24, 0], sizes = [8, 128], strides = [1, 1]} : vector<32x128xf32> to vector<8x128xf32>
    %6 = vector.extract_strided_slice %2 {offsets = [0, 0], sizes = [7, 128], strides = [1, 1]} : vector<8x128xf32> to vector<7x128xf32>
    %7 = vector.extract_strided_slice %3 {offsets = [0, 0], sizes = [7, 128], strides = [1, 1]} : vector<8x128xf32> to vector<7x128xf32>
    %8 = vector.extract_strided_slice %4 {offsets = [0, 0], sizes = [7, 128], strides = [1, 1]} : vector<8x128xf32> to vector<7x128xf32>
    %9 = tpu.concatenate %6, %7, %8 in 1 : vector<7x128xf32>, vector<7x128xf32>, vector<7x128xf32> -> vector<7x384xf32>
    %10 = arith.truncf %9 : vector<7x384xf32> to vector<7x384xbf16>
    %11 = vector.extract_strided_slice %3 {offsets = [0, 0], sizes = [7, 128], strides = [1, 1]} : vector<8x128xf32> to vector<7x128xf32>
    %12 = vector.extract_strided_slice %4 {offsets = [0, 0], sizes = [7, 128], strides = [1, 1]} : vector<8x128xf32> to vector<7x128xf32>
    %13 = vector.extract_strided_slice %5 {offsets = [0, 0], sizes = [7, 128], strides = [1, 1]} : vector<8x128xf32> to vector<7x128xf32>
    %14 = tpu.concatenate %11, %12, %13 in 1 : vector<7x128xf32>, vector<7x128xf32>, vector<7x128xf32> -> vector<7x384xf32>
    %15 = arith.truncf %14 : vector<7x384xf32> to vector<7x384xbf16>
    %16 = vector.extract_strided_slice %4 {offsets = [0, 0], sizes = [7, 128], strides = [1, 1]} : vector<8x128xf32> to vector<7x128xf32>
    %17 = vector.extract_strided_slice %5 {offsets = [0, 0], sizes = [7, 128], strides = [1, 1]} : vector<8x128xf32> to vector<7x128xf32>
    %18 = vector.extract_strided_slice %2 {offsets = [1, 0], sizes = [7, 128], strides = [1, 1]} : vector<8x128xf32> to vector<7x128xf32>
    %19 = tpu.concatenate %16, %17, %18 in 1 : vector<7x128xf32>, vector<7x128xf32>, vector<7x128xf32> -> vector<7x384xf32>
    %20 = arith.truncf %19 : vector<7x384xf32> to vector<7x384xbf16>
    %21 = vector.extract_strided_slice %5 {offsets = [0, 0], sizes = [7, 128], strides = [1, 1]} : vector<8x128xf32> to vector<7x128xf32>
    %22 = vector.extract_strided_slice %2 {offsets = [1, 0], sizes = [7, 128], strides = [1, 1]} : vector<8x128xf32> to vector<7x128xf32>
    %23 = vector.extract_strided_slice %3 {offsets = [1, 0], sizes = [7, 128], strides = [1, 1]} : vector<8x128xf32> to vector<7x128xf32>
    %24 = tpu.concatenate %21, %22, %23 in 1 : vector<7x128xf32>, vector<7x128xf32>, vector<7x128xf32> -> vector<7x384xf32>
    %25 = arith.truncf %24 : vector<7x384xf32> to vector<7x384xbf16>
    %c0_2 = arith.constant 0 : index
    %c0_3 = arith.constant 0 : index
    %26 = vector.load %arg2[%c0_2, %c0_3] : memref<384x112xbf16, #tpu.memory_space<vmem>>, vector<384x112xbf16>
    %cst = arith.constant dense<0.000000e+00> : vector<7x112xf32>
    %27 = tpu.matmul %10, %26, %cst {dimension_numbers = #tpu.dot_dimension_numbers<[1], [0], [0], [1], [0, 0, 1, 1], [], []>} : vector<7x384xbf16>, vector<384x112xbf16>, vector<7x112xf32> -> vector<7x112xf32>
    %c0_4 = arith.constant 0 : index
    %c0_5 = arith.constant 0 : index
    %28 = vector.load %arg3[%c0_4, %c0_5] : memref<384x112xbf16, #tpu.memory_space<vmem>>, vector<384x112xbf16>
    %cst_6 = arith.constant dense<0.000000e+00> : vector<7x112xf32>
    %29 = tpu.matmul %10, %28, %cst_6 {dimension_numbers = #tpu.dot_dimension_numbers<[1], [0], [0], [1], [0, 0, 1, 1], [], []>} : vector<7x384xbf16>, vector<384x112xbf16>, vector<7x112xf32> -> vector<7x112xf32>
    %30 = arith.maximumf %27, %29 : vector<7x112xf32>
    %c0_7 = arith.constant 0 : index
    %c0_8 = arith.constant 0 : index
    %31 = vector.load %arg2[%c0_7, %c0_8] : memref<384x112xbf16, #tpu.memory_space<vmem>>, vector<384x112xbf16>
    %cst_9 = arith.constant dense<0.000000e+00> : vector<7x112xf32>
    %32 = tpu.matmul %15, %31, %cst_9 {dimension_numbers = #tpu.dot_dimension_numbers<[1], [0], [0], [1], [0, 0, 1, 1], [], []>} : vector<7x384xbf16>, vector<384x112xbf16>, vector<7x112xf32> -> vector<7x112xf32>
    %c0_10 = arith.constant 0 : index
    %c0_11 = arith.constant 0 : index
    %33 = vector.load %arg3[%c0_10, %c0_11] : memref<384x112xbf16, #tpu.memory_space<vmem>>, vector<384x112xbf16>
    %cst_12 = arith.constant dense<0.000000e+00> : vector<7x112xf32>
    %34 = tpu.matmul %15, %33, %cst_12 {dimension_numbers = #tpu.dot_dimension_numbers<[1], [0], [0], [1], [0, 0, 1, 1], [], []>} : vector<7x384xbf16>, vector<384x112xbf16>, vector<7x112xf32> -> vector<7x112xf32>
    %35 = arith.maximumf %32, %34 : vector<7x112xf32>
    %36 = arith.maximumf %30, %35 : vector<7x112xf32>
    %c0_13 = arith.constant 0 : index
    %c0_14 = arith.constant 0 : index
    %37 = vector.load %arg4[%c0_13, %c0_14] : memref<1x112xf32, #tpu.memory_space<vmem>>, vector<1x112xf32>
    %38 = vector.broadcast %37 : vector<1x112xf32> to vector<7x112xf32>
    %39 = arith.addf %36, %38 : vector<7x112xf32>
    %cst_15 = arith.constant 0.000000e+00 : f32
    %cst_16 = arith.constant 6.000000e+00 : f32
    %40 = vector.broadcast %cst_15 : f32 to vector<7x112xf32>
    %41 = arith.maximumf %40, %39 : vector<7x112xf32>
    %42 = vector.broadcast %cst_16 : f32 to vector<7x112xf32>
    %43 = arith.minimumf %42, %41 : vector<7x112xf32>
    %c0_17 = arith.constant 0 : index
    %c0_18 = arith.constant 0 : index
    %44 = vector.load %arg2[%c0_17, %c0_18] : memref<384x112xbf16, #tpu.memory_space<vmem>>, vector<384x112xbf16>
    %cst_19 = arith.constant dense<0.000000e+00> : vector<7x112xf32>
    %45 = tpu.matmul %20, %44, %cst_19 {dimension_numbers = #tpu.dot_dimension_numbers<[1], [0], [0], [1], [0, 0, 1, 1], [], []>} : vector<7x384xbf16>, vector<384x112xbf16>, vector<7x112xf32> -> vector<7x112xf32>
    %c0_20 = arith.constant 0 : index
    %c0_21 = arith.constant 0 : index
    %46 = vector.load %arg3[%c0_20, %c0_21] : memref<384x112xbf16, #tpu.memory_space<vmem>>, vector<384x112xbf16>
    %cst_22 = arith.constant dense<0.000000e+00> : vector<7x112xf32>
    %47 = tpu.matmul %20, %46, %cst_22 {dimension_numbers = #tpu.dot_dimension_numbers<[1], [0], [0], [1], [0, 0, 1, 1], [], []>} : vector<7x384xbf16>, vector<384x112xbf16>, vector<7x112xf32> -> vector<7x112xf32>
    %48 = arith.maximumf %45, %47 : vector<7x112xf32>
    %c0_23 = arith.constant 0 : index
    %c0_24 = arith.constant 0 : index
    %49 = vector.load %arg2[%c0_23, %c0_24] : memref<384x112xbf16, #tpu.memory_space<vmem>>, vector<384x112xbf16>
    %cst_25 = arith.constant dense<0.000000e+00> : vector<7x112xf32>
    %50 = tpu.matmul %25, %49, %cst_25 {dimension_numbers = #tpu.dot_dimension_numbers<[1], [0], [0], [1], [0, 0, 1, 1], [], []>} : vector<7x384xbf16>, vector<384x112xbf16>, vector<7x112xf32> -> vector<7x112xf32>
    %c0_26 = arith.constant 0 : index
    %c0_27 = arith.constant 0 : index
    %51 = vector.load %arg3[%c0_26, %c0_27] : memref<384x112xbf16, #tpu.memory_space<vmem>>, vector<384x112xbf16>
    %cst_28 = arith.constant dense<0.000000e+00> : vector<7x112xf32>
    %52 = tpu.matmul %25, %51, %cst_28 {dimension_numbers = #tpu.dot_dimension_numbers<[1], [0], [0], [1], [0, 0, 1, 1], [], []>} : vector<7x384xbf16>, vector<384x112xbf16>, vector<7x112xf32> -> vector<7x112xf32>
    %53 = arith.maximumf %50, %52 : vector<7x112xf32>
    %54 = arith.maximumf %48, %53 : vector<7x112xf32>
    %c0_29 = arith.constant 0 : index
    %c0_30 = arith.constant 0 : index
    %55 = vector.load %arg4[%c0_29, %c0_30] : memref<1x112xf32, #tpu.memory_space<vmem>>, vector<1x112xf32>
    %56 = vector.broadcast %55 : vector<1x112xf32> to vector<7x112xf32>
    %57 = arith.addf %54, %56 : vector<7x112xf32>
    %cst_31 = arith.constant 0.000000e+00 : f32
    %cst_32 = arith.constant 6.000000e+00 : f32
    %58 = vector.broadcast %cst_31 : f32 to vector<7x112xf32>
    %59 = arith.maximumf %58, %57 : vector<7x112xf32>
    %60 = vector.broadcast %cst_32 : f32 to vector<7x112xf32>
    %61 = arith.minimumf %60, %59 : vector<7x112xf32>
    %cst_33 = arith.constant 0.000000e+00 : f32
    %62 = vector.broadcast %cst_33 : f32 to vector<8x128xf32>
    %c0_34 = arith.constant 0 : index
    %c0_35 = arith.constant 0 : index
    %63 = vector.load %arg11[%c0_34, %c0_35] : memref<8x128xf32, #tpu.memory_space<vmem>>, vector<8x128xf32>
    tpu.vector_store %arg11[%c0_34, %c0_35], %62 {strides = array<i32>} : memref<8x128xf32, #tpu.memory_space<vmem>>, vector<8x128xf32>,
    %cst_36 = arith.constant 0.000000e+00 : f32
    %64 = vector.broadcast %cst_36 : f32 to vector<8x128xf32>
    %c0_37 = arith.constant 0 : index
    %c0_38 = arith.constant 0 : index
    %65 = vector.load %arg12[%c0_37, %c0_38] : memref<8x128xf32, #tpu.memory_space<vmem>>, vector<8x128xf32>
    tpu.vector_store %arg12[%c0_37, %c0_38], %64 {strides = array<i32>} : memref<8x128xf32, #tpu.memory_space<vmem>>, vector<8x128xf32>,
    %c1 = arith.constant 1 : index
    %c0_39 = arith.constant 0 : index
    %66 = vector.load %arg11[%c1, %c0_39] : memref<8x128xf32, #tpu.memory_space<vmem>>, vector<7x112xf32>
    tpu.vector_store %arg11[%c1, %c0_39], %61 {strides = array<i32>} : memref<8x128xf32, #tpu.memory_space<vmem>>, vector<7x112xf32>,
    %c0_40 = arith.constant 0 : index
    %c0_41 = arith.constant 0 : index
    %67 = vector.load %arg12[%c0_40, %c0_41] : memref<8x128xf32, #tpu.memory_space<vmem>>, vector<7x112xf32>
    tpu.vector_store %arg12[%c0_40, %c0_41], %43 {strides = array<i32>} : memref<8x128xf32, #tpu.memory_space<vmem>>, vector<7x112xf32>,
    %c0_42 = arith.constant 0 : index
    %c0_43 = arith.constant 0 : index
    %68 = vector.load %arg11[%c0_42, %c0_43] : memref<8x128xf32, #tpu.memory_space<vmem>>, vector<8x128xf32>
    %c0_44 = arith.constant 0 : index
    %c0_45 = arith.constant 0 : index
    %69 = vector.load %arg12[%c0_44, %c0_45] : memref<8x128xf32, #tpu.memory_space<vmem>>, vector<8x128xf32>
    %70 = vector.extract_strided_slice %68 {offsets = [0, 0], sizes = [7, 128], strides = [1, 1]} : vector<8x128xf32> to vector<7x128xf32>
    %71 = vector.extract_strided_slice %69 {offsets = [0, 0], sizes = [7, 128], strides = [1, 1]} : vector<8x128xf32> to vector<7x128xf32>
    %72 = vector.extract_strided_slice %68 {offsets = [1, 0], sizes = [7, 128], strides = [1, 1]} : vector<8x128xf32> to vector<7x128xf32>
    %73 = tpu.concatenate %70, %71, %72 in 1 : vector<7x128xf32>, vector<7x128xf32>, vector<7x128xf32> -> vector<7x384xf32>
    %74 = arith.truncf %73 : vector<7x384xf32> to vector<7x384xbf16>
    %75 = vector.extract_strided_slice %69 {offsets = [0, 0], sizes = [7, 128], strides = [1, 1]} : vector<8x128xf32> to vector<7x128xf32>
    %76 = vector.extract_strided_slice %68 {offsets = [1, 0], sizes = [7, 128], strides = [1, 1]} : vector<8x128xf32> to vector<7x128xf32>
    %77 = vector.extract_strided_slice %69 {offsets = [1, 0], sizes = [7, 128], strides = [1, 1]} : vector<8x128xf32> to vector<7x128xf32>
    %78 = tpu.concatenate %75, %76, %77 in 1 : vector<7x128xf32>, vector<7x128xf32>, vector<7x128xf32> -> vector<7x384xf32>
    %79 = arith.truncf %78 : vector<7x384xf32> to vector<7x384xbf16>
    %c0_46 = arith.constant 0 : index
    %c0_47 = arith.constant 0 : index
    %80 = vector.load %arg5[%c0_46, %c0_47] : memref<384x112xbf16, #tpu.memory_space<vmem>>, vector<384x112xbf16>
    %cst_48 = arith.constant dense<0.000000e+00> : vector<7x112xf32>
    %81 = tpu.matmul %74, %80, %cst_48 {dimension_numbers = #tpu.dot_dimension_numbers<[1], [0], [0], [1], [0, 0, 1, 1], [], []>} : vector<7x384xbf16>, vector<384x112xbf16>, vector<7x112xf32> -> vector<7x112xf32>
    %c0_49 = arith.constant 0 : index
    %c0_50 = arith.constant 0 : index
    %82 = vector.load %arg6[%c0_49, %c0_50] : memref<384x112xbf16, #tpu.memory_space<vmem>>, vector<384x112xbf16>
    %cst_51 = arith.constant dense<0.000000e+00> : vector<7x112xf32>
    %83 = tpu.matmul %74, %82, %cst_51 {dimension_numbers = #tpu.dot_dimension_numbers<[1], [0], [0], [1], [0, 0, 1, 1], [], []>} : vector<7x384xbf16>, vector<384x112xbf16>, vector<7x112xf32> -> vector<7x112xf32>
    %84 = arith.maximumf %81, %83 : vector<7x112xf32>
    %c0_52 = arith.constant 0 : index
    %c0_53 = arith.constant 0 : index
    %85 = vector.load %arg5[%c0_52, %c0_53] : memref<384x112xbf16, #tpu.memory_space<vmem>>, vector<384x112xbf16>
    %cst_54 = arith.constant dense<0.000000e+00> : vector<7x112xf32>
    %86 = tpu.matmul %79, %85, %cst_54 {dimension_numbers = #tpu.dot_dimension_numbers<[1], [0], [0], [1], [0, 0, 1, 1], [], []>} : vector<7x384xbf16>, vector<384x112xbf16>, vector<7x112xf32> -> vector<7x112xf32>
    %c0_55 = arith.constant 0 : index
    %c0_56 = arith.constant 0 : index
    %87 = vector.load %arg6[%c0_55, %c0_56] : memref<384x112xbf16, #tpu.memory_space<vmem>>, vector<384x112xbf16>
    %cst_57 = arith.constant dense<0.000000e+00> : vector<7x112xf32>
    %88 = tpu.matmul %79, %87, %cst_57 {dimension_numbers = #tpu.dot_dimension_numbers<[1], [0], [0], [1], [0, 0, 1, 1], [], []>} : vector<7x384xbf16>, vector<384x112xbf16>, vector<7x112xf32> -> vector<7x112xf32>
    %89 = arith.maximumf %86, %88 : vector<7x112xf32>
    %90 = arith.maximumf %84, %89 : vector<7x112xf32>
    %c0_58 = arith.constant 0 : index
    %c0_59 = arith.constant 0 : index
    %91 = vector.load %arg7[%c0_58, %c0_59] : memref<1x112xf32, #tpu.memory_space<vmem>>, vector<1x112xf32>
    %92 = vector.broadcast %91 : vector<1x112xf32> to vector<7x112xf32>
    %93 = arith.addf %90, %92 : vector<7x112xf32>
    %cst_60 = arith.constant 0.000000e+00 : f32
    %cst_61 = arith.constant 6.000000e+00 : f32
    %94 = vector.broadcast %cst_60 : f32 to vector<7x112xf32>
    %95 = arith.maximumf %94, %93 : vector<7x112xf32>
    %96 = vector.broadcast %cst_61 : f32 to vector<7x112xf32>
    %97 = arith.minimumf %96, %95 : vector<7x112xf32>
    %98 = arith.truncf %97 : vector<7x112xf32> to vector<7x112xbf16>
    %99 = vector.extract_strided_slice %98 {offsets = [0, 0], sizes = [1, 112], strides = [1, 1]} : vector<7x112xbf16> to vector<1x112xbf16>
    %100 = vector.extract_strided_slice %98 {offsets = [1, 0], sizes = [1, 112], strides = [1, 1]} : vector<7x112xbf16> to vector<1x112xbf16>
    %101 = vector.extract_strided_slice %98 {offsets = [2, 0], sizes = [1, 112], strides = [1, 1]} : vector<7x112xbf16> to vector<1x112xbf16>
    %102 = vector.extract_strided_slice %98 {offsets = [3, 0], sizes = [1, 112], strides = [1, 1]} : vector<7x112xbf16> to vector<1x112xbf16>
    %103 = vector.extract_strided_slice %98 {offsets = [4, 0], sizes = [1, 112], strides = [1, 1]} : vector<7x112xbf16> to vector<1x112xbf16>
    %104 = vector.extract_strided_slice %98 {offsets = [5, 0], sizes = [1, 112], strides = [1, 1]} : vector<7x112xbf16> to vector<1x112xbf16>
    %105 = vector.extract_strided_slice %98 {offsets = [6, 0], sizes = [1, 112], strides = [1, 1]} : vector<7x112xbf16> to vector<1x112xbf16>
    %106 = tpu.concatenate %99, %100, %101, %102, %103, %104, %105 in 1 : vector<1x112xbf16>, vector<1x112xbf16>, vector<1x112xbf16>, vector<1x112xbf16>, vector<1x112xbf16>, vector<1x112xbf16>, vector<1x112xbf16> -> vector<1x784xbf16>
    %c0_62 = arith.constant 0 : index
    %c0_63 = arith.constant 0 : index
    %107 = vector.load %arg8[%c0_62, %c0_63] : memref<784x10xbf16, #tpu.memory_space<vmem>>, vector<784x10xbf16>
    %cst_64 = arith.constant dense<0.000000e+00> : vector<1x10xf32>
    %108 = tpu.matmul %106, %107, %cst_64 {dimension_numbers = #tpu.dot_dimension_numbers<[1], [0], [0], [1], [0, 0, 1, 1], [], []>} : vector<1x784xbf16>, vector<784x10xbf16>, vector<1x10xf32> -> vector<1x10xf32>
    %c0_65 = arith.constant 0 : index
    %c0_66 = arith.constant 0 : index
    %109 = vector.load %arg9[%c0_65, %c0_66] : memref<1x10xf32, #tpu.memory_space<vmem>>, vector<1x10xf32>
    %110 = arith.addf %108, %109 : vector<1x10xf32>
    %c0_67 = arith.constant 0 : index
    %c0_68 = arith.constant 0 : index
    %c0_69 = arith.constant 0 : index
    %111 = vector.load %arg10[%c0_67, %c0_68, %c0_69] : memref<1x1x10xf32, #tpu.memory_space<vmem>>, vector<1x1x10xf32>
    %112 = vector.shape_cast %111 : vector<1x1x10xf32> to vector<1x10xf32>
    %113 = vector.shape_cast %110 : vector<1x10xf32> to vector<1x1x10xf32>
    tpu.vector_store %arg10[%c0_67, %c0_68, %c0_69], %113 {strides = array<i32>} : memref<1x1x10xf32, #tpu.memory_space<vmem>>, vector<1x1x10xf32>,
    return
  }
  func.func @transform_0(%arg0: i32) -> (i32, i32, i32) {
    %c0_i32 = arith.constant 0 : i32
    %c0_i32_0 = arith.constant 0 : i32
    %c0_i32_1 = arith.constant 0 : i32
    return %arg0, %c0_i32, %c0_i32_0 : i32, i32, i32
  }
  func.func @transform_1(%arg0: i32) -> (i32, i32) {
    %c0_i32 = arith.constant 0 : i32
    %c0_i32_0 = arith.constant 0 : i32
    %c0_i32_1 = arith.constant 0 : i32
    return %c0_i32, %c0_i32_0 : i32, i32
  }
  func.func @transform_2(%arg0: i32) -> (i32, i32) {
    %c0_i32 = arith.constant 0 : i32
    %c0_i32_0 = arith.constant 0 : i32
    %c0_i32_1 = arith.constant 0 : i32
    return %c0_i32, %c0_i32_0 : i32, i32
  }
  func.func @transform_3(%arg0: i32) -> (i32, i32) {
    %c0_i32 = arith.constant 0 : i32
    %c0_i32_0 = arith.constant 0 : i32
    %c0_i32_1 = arith.constant 0 : i32
    return %c0_i32, %c0_i32_0 : i32, i32
  }
  func.func @transform_4(%arg0: i32) -> (i32, i32) {
    %c0_i32 = arith.constant 0 : i32
    %c0_i32_0 = arith.constant 0 : i32
    %c0_i32_1 = arith.constant 0 : i32
    return %c0_i32, %c0_i32_0 : i32, i32
  }
  func.func @transform_5(%arg0: i32) -> (i32, i32) {
    %c0_i32 = arith.constant 0 : i32
    %c0_i32_0 = arith.constant 0 : i32
    %c0_i32_1 = arith.constant 0 : i32
    return %c0_i32, %c0_i32_0 : i32, i32
  }
  func.func @transform_6(%arg0: i32) -> (i32, i32) {
    %c0_i32 = arith.constant 0 : i32
    %c0_i32_0 = arith.constant 0 : i32
    %c0_i32_1 = arith.constant 0 : i32
    return %c0_i32, %c0_i32_0 : i32, i32
  }
  func.func @transform_7(%arg0: i32) -> (i32, i32) {
    %c0_i32 = arith.constant 0 : i32
    %c0_i32_0 = arith.constant 0 : i32
    %c0_i32_1 = arith.constant 0 : i32
    return %c0_i32, %c0_i32_0 : i32, i32
  }
  func.func @transform_8(%arg0: i32) -> (i32, i32) {
    %c0_i32 = arith.constant 0 : i32
    %c0_i32_0 = arith.constant 0 : i32
    %c0_i32_1 = arith.constant 0 : i32
    return %c0_i32, %c0_i32_0 : i32, i32
  }
  func.func @transform_9(%arg0: i32) -> (i32, i32, i32) {
    %c0_i32 = arith.constant 0 : i32
    %c0_i32_0 = arith.constant 0 : i32
    %c0_i32_1 = arith.constant 0 : i32
    return %arg0, %c0_i32, %c0_i32_0 : i32, i32, i32
  }
}

</mosaic_0001>

<bundles_post_ra>
// kernel: simple_cnn2d_forward.1
= control target key start
LH: loop header
LB: loop body
LE: loop exit
PB: predicated region body
PF: predicated region fallthrough
CT: control target
= control target key end

     0   :  { %14 = vsyncpa [#allocation5], 0  ;;  %s5220_s0 = inlined_call_operand.vmem [shape: f32[2,32,128], index: 0, kind: input, shape index: {}]   ;;  %s5221_s1 = inlined_call_operand.vmem [shape: bf16[384,112], index: 1, kind: input, shape index: {}]   ;;  %s5222_s2 = inlined_call_operand.vmem [shape: bf16[384,112], index: 2, kind: input, shape index: {}]   ;;  %s5223_s3 = inlined_call_operand.vmem [shape: f32[1,112], index: 3, kind: input, shape index: {}]   ;;  %s5224_s4 = inlined_call_operand.vmem [shape: bf16[384,112], index: 4, kind: input, shape index: {}]   ;;  %s5225_s5 = inlined_call_operand.vmem [shape: bf16[384,112], index: 5, kind: input, shape index: {}]   ;;  %s5226_s6 = inlined_call_operand.vmem [shape: f32[1,112], index: 6, kind: input, shape index: {}]   ;;  %s5227_s7 = inlined_call_operand.vmem [shape: bf16[784,10], index: 7, kind: input, shape index: {}]   ;;  %s5228_s8 = inlined_call_operand.vmem [shape: f32[1,10], index: 8, kind: input, shape index: {}]   ;;  %s5229_s9 = inlined_call_operand.hbm [shape: f32[2,1,10], index: 9, kind: output, shape index: {}]  }
   0x1   :  { %16 = vsyncpa [#allocation5 + $0x1], 0  ;;  %s3971_s30 = smov 0   ;;  %s3973_s10 = smov 0  }
   0x2   :  { %s3975_s11 = smov 0   ;;  %s3977_s12 = smov 0  }
   0x3 LB: > { %s3992_s13 = sadd.s32 4294967295, %s3910_s12   ;;  %s2796_s14 = sadd.s32 4294967294, %s3910_s12   ;;  %s3910_s12 = sphi %s3977_s12, %s5235_s12   ;;  %s3906_s11 = sphi %s3975_s11, %s5234_s11   ;;  %s3902_s10 = sphi %s3973_s10, %s5233_s10   ;;  %s3898_s30 = sphi %s3971_s30, %s5232_s30  }
   0x4   : > { %s3996_s15 = sadd.s32 1, %s3910_s12   ;;  %s223_s16 = sadd.s32 1, %s3906_s11 }
   0x5   : > { %s220_s17 = ssub.s32 %s3910_s12, %s3996_s15  ;;  %p233_p0 = scmp.ne.s32.totalorder %s3906_s11, %s3902_s10 }
   0x6   : > { %p221_p1 = scmp.eq.s32.totalorder %s220_s17, 0  ;;  %p234_p2 = scmp.eq.s32.totalorder %s3992_s13, 1 }
   0x7   : > { %p239_p3 = scmp.ne.s32.totalorder %s3902_s10, %s3898_s30  ;;  %p240_p4 = scmp.eq.s32.totalorder %s2796_s14, 1 }
   0x8   : > { %s4007_s18 = scalar_select %p221_p1, %s3906_s11, %s223_s16  }
   0x9   : > { %p4009_p5 = por %p234_p2, %p233_p0  ;;  %p4013_p6 = por %p240_p4, %p239_p3 }
   0xa   : > { %p2799_p7 = scmp.ge.s32.totalorder %s3910_s12, 1  ;;  %p290_p8 = scmp.lt.s32.totalorder %s3910_s12, 3 }
   0xc   : > { %p291_p9 = pnand %p2799_p7, %p290_p8 }
   0xd   : > { %p325_p10 = scmp.lt.s32.totalorder (!%p291_p9), %s3992_s13, 1  ;;  %s3914_s26 = smov (!%p291_p9), 64  }
   0xe   : > { %294 = sbr.rel (%p291_p9) target bundleno = 1172 (0x494), region = 56  ;;  %s3915_s28 = smov (!%p291_p9), 112  }
   0xf   : > { %s3916_s29 = smov (!%p291_p9), 96   ;;  %s3917_s16 = smov (!%p291_p9), 80  }
  0x10   : > { %s3919_s17 = smov (!%p291_p9), 32  }
  0x13   : > { %v4022_v0 = vld [vmem:[%s5221_s1 + $0x78] sm:$0xff]   ;;  %v3912_v1 = vmov 0.0   ;;  %vm3913_vm0 = vmmov 0   ;;  %v4044_v4 = vld [vmem:[%s5221_s1 + $0x70] sm:$0xff]   ;;  %v4062_v7 = vld [vmem:[%s5221_s1 + $0x68] sm:$0xff]   ;;  %s326_s23 = scalar_select %p325_p10, %s3992_s13, 1 }
  0x14   : > { %3394 = vmatprep.subr.bf16.mxu1 %v3912_v1  ;;  %1390 = vst [vmem:[#allocation2] sm:$0xff] %v3912_v1  ;;  %1391 = vst [vmem:[#allocation3] sm:$0xff] %v3912_v1  ;;  %v4030_v2 = vld [vmem:[%s5221_s1 + $0xb8] sm:$0xff]   ;;  %2954 = vmatprep.subr.bf16.mxu0 %v4022_v0  ;;  %v4051_v5 = vld [vmem:[%s5221_s1 + $0xb0] sm:$0xff]   ;;  %vm1392_vm1 = vcmask 915456   ;;  %vm2154_vm2 = vcmask 654336  }
  0x15   : > { %v4036_v3 = vld [vmem:[%s5221_s1 + $0x38] sm:$0xff]   ;;  %3410 = vmatprep.mubr.msk.bf16.mxu1 %vm3913_vm0, %v3912_v1  ;;  %3395 = vmatpush3.bf16.msra.mxu1 %v4030_v2  ;;  %v4057_v6 = vld [vmem:[%s5221_s1 + $0x30] sm:$0xff]   ;;  %v4068_v8 = vld [vmem:[%s5221_s1 + $0xa8] sm:$0xff]   ;;  %s2953_s14 = sshll.u32 %s326_s23, 5  ;;  %vm2150_vm3 = vcmask 785408   ;;  %vm2158_vm4 = vcmask 523264  }
  0x16   : > { %2955 = vmatpush3.bf16.msra.mxu0 %v4036_v3  ;;  %3396 = vmatprep.subr.bf16.mxu1 %v3912_v1  ;;  %v4075_v9 = vld [vmem:[%s5221_s1 + $0x28] sm:$0xff]   ;;  %v4081_v10 = vld [vmem:[%s5221_s1 + $0x60] sm:$0xff]   ;;  %v4101_v13 = vld [vmem:[%s5221_s1 + $0x58] sm:$0xff]   ;;  %s4145_s27 = scalar_lea.vmem %s5220_s0, %s2953_s14  ;;  %vm2146_vm5 = vcmask 916480   ;;  %vm2166_vm6 = vcmask 261120   ;;  %vm2563_vm7 = vcmask 130048  }
  0x17   : > { %2956 = vmatprep.subr.bf16.mxu0 %v4044_v4  ;;  %v4088_v11 = vld [vmem:[%s5221_s1 + $0xa0] sm:$0xff]   ;;  %v4108_v14 = vld [vmem:[%s5221_s1 + $0x98] sm:$0xff]   ;;  %v4121_v16 = vld [vmem:[%s5221_s1 + $0x50] sm:$0xff]   ;;  %vm2162_vm8 = vcmask 392192   ;;  %vm2726_vm9 = vcmask 73728  }
  0x18   : > { %v4095_v12 = vld [vmem:[%s5221_s1 + $0x20] sm:$0xff]   ;;  %v4115_v15 = vld [vmem:[%s5221_s1 + $0x18] sm:$0xff]   ;;  %v4127_v17 = vld [vmem:[%s5221_s1 + $0x90] sm:$0xff]  }
  0x19   : > { %3397 = vmatpush3.bf16.msra.mxu1 %v4051_v5  ;;  %v4134_v18 = vld [vmem:[%s5221_s1 + $0x10] sm:$0xff]   ;;  %v4140_v19 = vld [vmem:[%s5221_s1 + $0x48] sm:$0xff]   ;;  %v4163_v22 = vld [vmem:[%s5221_s1 + $0x40] sm:$0xff]  }
  0x1a   : > { %2957 = vmatpush3.bf16.msra.mxu0 %v4057_v6  ;;  %3398 = vmatprep.subr.bf16.mxu1 %v3912_v1  ;;  %v4151_v20 = vld [vmem:[%s5221_s1 + $0x88] sm:$0xff]   ;;  %v4172_v24 = vld [vmem:[%s5221_s1 + $0x80] sm:$0xff]   ;;  %v333_v27 = vld [vmem:[%s4145_s27 + $0x10] sm:$0xff] }
  0x1b   : > { %2958 = vmatprep.subr.bf16.mxu0 %v4062_v7  ;;  %v4158_v21 = vld [vmem:[%s5221_s1 + $0x8] sm:$0xff]   ;;  %v4181_v26 = vld [vmem:[%s5221_s1] sm:$0xff]   ;;  %v4195_v29 = vld [vmem:[%s5222_s2 + $0x78] sm:$0xff]   ;;  %v4197_v30 = vpack.c.bf16 %v333_v27, %v333_v27 }
  0x1c   : > { %v4166_v23 = vld [vmem:[%s4145_s27 + $0x8] sm:$0xff]  ;;  %v4189_v28 = vld [vmem:[%s4145_s27] sm:$0xff]  ;;  %v4207_v32 = vld [vmem:[%s5222_s2 + $0xb8] sm:$0xff]  }
  0x1d   : > { %3399 = vmatpush3.bf16.msra.mxu1 %v4068_v8  ;;  %v4176_v25 = vpack.c.bf16 %v4166_v23, %v4166_v23  ;;  %v4202_v31 = vpack.c.bf16 %v4189_v28, %v4189_v28  ;;  %v4214_v33 = vld [vmem:[%s5222_s2 + $0x38] sm:$0xff]   ;;  %v4220_v34 = vld [vmem:[%s5222_s2 + $0x70] sm:$0xff]   ;;  %v4241_v37 = vld [vmem:[%s5222_s2 + $0x68] sm:$0xff]   ;;  %v340_v58 = vrot.slane %v4189_v28, 1 }
  0x1e   : > { %2959 = vmatpush3.bf16.msra.mxu0 %v4075_v9  ;;  %3400 = vmatprep.subr.bf16.mxu1 %v3912_v1  ;;  %v4228_v35 = vld [vmem:[%s5222_s2 + $0xb0] sm:$0xff]   ;;  %v4250_v38 = vld [vmem:[%s5222_s2 + $0xa8] sm:$0xff]   ;;  %v4263_v40 = vld [vmem:[%s5222_s2 + $0x60] sm:$0xff]  }
  0x1f   : > { %2960 = vmatprep.subr.bf16.mxu0 %v4081_v10  ;;  %571 = vmatprep.mubr.bf16.mxu0 %v4176_v25  ;;  %v4235_v36 = vld [vmem:[%s5222_s2 + $0x30] sm:$0xff]   ;;  %v4257_v39 = vld [vmem:[%s5222_s2 + $0x28] sm:$0xff]   ;;  %v4269_v41 = vld [vmem:[%s5222_s2 + $0xa0] sm:$0xff]   ;;  %v4472_v59 = vpack.c.bf16 %v340_v58, %v340_v58 }
  0x20   : > { %v4276_v42 = vld [vmem:[%s5222_s2 + $0x20] sm:$0xff]   ;;  %v4282_v43 = vld [vmem:[%s5222_s2 + $0x58] sm:$0xff]   ;;  %v4300_v46 = vld [vmem:[%s5222_s2 + $0x50] sm:$0xff]  }
  0x21   : > { %3401 = vmatpush3.bf16.msra.mxu1 %v4088_v11  ;;  %v4287_v44 = vld [vmem:[%s5222_s2 + $0x98] sm:$0xff]   ;;  %v4306_v47 = vld [vmem:[%s5222_s2 + $0x90] sm:$0xff]   ;;  %v4317_v49 = vld [vmem:[%s5222_s2 + $0x48] sm:$0xff]  }
  0x22   : > { %2961 = vmatpush3.bf16.msra.mxu0 %v4095_v12  ;;  %3402 = vmatprep.subr.bf16.mxu1 %v3912_v1  ;;  %v4293_v45 = vld [vmem:[%s5222_s2 + $0x18] sm:$0xff]   ;;  %v4311_v48 = vld [vmem:[%s5222_s2 + $0x10] sm:$0xff]   ;;  %v4325_v50 = vld [vmem:[%s5222_s2 + $0x88] sm:$0xff]  }
  0x23   : > { %2962 = vmatprep.subr.bf16.mxu0 %v4101_v13  ;;  %v4330_v51 = vld [vmem:[%s5222_s2 + $0x8] sm:$0xff]   ;;  %v4336_v52 = vld [vmem:[%s5222_s2 + $0x40] sm:$0xff]   ;;  %v334_v55 = vld [vmem:[%s4145_s27 + $0x18] sm:$0xff]  ;;  %s3918_s27 = smov 48  }
  0x24   : > { %v4344_v53 = vld [vmem:[%s5222_s2 + $0x80] sm:$0xff]   ;;  %v4393_v56 = vpack.c.bf16 %v334_v55, %v334_v55  ;;  %v3833_v60 = vld [vmem:[%s5221_s1 + $0x78] sm:$0xff]   ;;  %v3836_v63 = vld [vmem:[%s5221_s1 + $0x70] sm:$0xff]  }
  0x25   : > { %3403 = vmatpush3.bf16.msra.mxu1 %v4108_v14  ;;  %v4349_v54 = vld [vmem:[%s5222_s2] sm:$0xff]   ;;  %v3834_v61 = vld [vmem:[%s5221_s1 + $0xb8] sm:$0xff]   ;;  %v4673_v55 = vld [vmem:[%s5224_s4 + $0x28] sm:$0xff]  }
  0x26   : > { %2963 = vmatpush3.bf16.msra.mxu0 %v4115_v15  ;;  %3404 = vmatprep.subr.bf16.mxu1 %v3912_v1  ;;  %v4459_v57 = vld [vmem:[#allocation2] sm:$0xff]  ;;  %v3835_v62 = vld [vmem:[%s5221_s1 + $0x38] sm:$0xff]  }
  0x27   : > { %2964 = vmatprep.subr.bf16.mxu0 %v4121_v16 }
  0x29   : > { %3405 = vmatpush3.bf16.msra.mxu1 %v4127_v17 }
  0x2a   : > { %2965 = vmatpush3.bf16.msra.mxu0 %v4134_v18  ;;  %3406 = vmatprep.subr.bf16.mxu1 %v3912_v1 }
  0x2b   : > { %2966 = vmatprep.subr.bf16.mxu0 %v4140_v19 }
  0x2d   : > { %3407 = vmatpush3.bf16.msra.mxu1 %v4151_v20 }
  0x2e   : > { %2967 = vmatpush3.bf16.msra.mxu0 %v4158_v21  ;;  %3408 = vmatprep.subr.bf16.mxu1 %v3912_v1 }
  0x2f   : > { %2968 = vmatprep.subr.bf16.mxu0 %v4163_v22 }
  0x31   : > { %3409 = vmatpush3.bf16.msra.mxu1 %v4172_v24 }
  0x32   : > { %2969 = vmatpush3.bf16.msra.mxu0 %v4181_v26  ;;  %3414 = vmatprep.subr.bf16.mxu1 %v3912_v1 }
  0x33   : > { %2985 = vmatprep.subr.bf16.mxu0 %v4195_v29 }
  0x34   : > { %3411 = vmatmul.mubr.bf16.vlgmr.msra.gmra.mxu1 %v4197_v30 }
  0x35   : > { %572 = vmatmul.mubr.bf16.vlgmr.msra.gmra.mxu0 %v4202_v31  ;;  %3415 = vmatpush3.bf16.msra.mxu1 %v4207_v32 }
  0x36   : > { %2986 = vmatpush3.bf16.msra.mxu0 %v4214_v33  ;;  %3416 = vmatprep.subr.bf16.mxu1 %v3912_v1 }
  0x37   : > { %2987 = vmatprep.subr.bf16.mxu0 %v4220_v34  ;;  %3430 = vmatprep.mubr.msk.bf16.mxu1 %vm3913_vm0, %v3912_v1 }
  0x38   : > { %843 = vmatprep.mubr.bf16.mxu0 %v4176_v25 }
  0x39   : > { %3417 = vmatpush3.bf16.msra.mxu1 %v4228_v35 }
  0x3a   : > { %2988 = vmatpush3.bf16.msra.mxu0 %v4235_v36  ;;  %3418 = vmatprep.subr.bf16.mxu1 %v3912_v1 }
  0x3b   : > { %2989 = vmatprep.subr.bf16.mxu0 %v4241_v37 }
  0x3d   : > { %3419 = vmatpush3.bf16.msra.mxu1 %v4250_v38 }
  0x3e   : > { %2990 = vmatpush3.bf16.msra.mxu0 %v4257_v39  ;;  %3420 = vmatprep.subr.bf16.mxu1 %v3912_v1 }
  0x3f   : > { %2991 = vmatprep.subr.bf16.mxu0 %v4263_v40 }
  0x41   : > { %3421 = vmatpush3.bf16.msra.mxu1 %v4269_v41 }
  0x42   : > { %2992 = vmatpush3.bf16.msra.mxu0 %v4276_v42  ;;  %3422 = vmatprep.subr.bf16.mxu1 %v3912_v1 }
  0x43   : > { %2993 = vmatprep.subr.bf16.mxu0 %v4282_v43 }
  0x45   : > { %3423 = vmatpush3.bf16.msra.mxu1 %v4287_v44 }
  0x46   : > { %2994 = vmatpush3.bf16.msra.mxu0 %v4293_v45  ;;  %3424 = vmatprep.subr.bf16.mxu1 %v3912_v1 }
  0x47   : > { %2995 = vmatprep.subr.bf16.mxu0 %v4300_v46 }
  0x49   : > { %3425 = vmatpush3.bf16.msra.mxu1 %v4306_v47 }
  0x4a   : > { %2996 = vmatpush3.bf16.msra.mxu0 %v4311_v48  ;;  %3426 = vmatprep.subr.bf16.mxu1 %v3912_v1 }
  0x4b   : > { %2997 = vmatprep.subr.bf16.mxu0 %v4317_v49 }
  0x4d   : > { %3427 = vmatpush3.bf16.msra.mxu1 %v4325_v50 }
  0x4e   : > { %2998 = vmatpush3.bf16.msra.mxu0 %v4330_v51  ;;  %3428 = vmatprep.subr.bf16.mxu1 %v3912_v1 }
  0x4f   : > { %2999 = vmatprep.subr.bf16.mxu0 %v4336_v52 }
  0x51   : > { %3429 = vmatpush3.bf16.msra.mxu1 %v4344_v53 }
  0x52   : > { %3000 = vmatpush3.bf16.msra.mxu0 %v4349_v54  ;;  %3434 = vmatprep.subr.bf16.mxu1 %v3912_v1 }
  0x53   : > { %3016 = vmatprep.subr.bf16.mxu0 %v4022_v0 }
  0x54   : > { %3431 = vmatmul.mubr.bf16.vlgmr.msra.gmra.mxu1 %v4197_v30 }
  0x55   : > { %844 = vmatmul.mubr.bf16.vlgmr.msra.gmra.mxu0 %v4202_v31  ;;  %3435 = vmatpush3.bf16.msra.mxu1 %v4030_v2 }
  0x56   : > { %3017 = vmatpush3.bf16.msra.mxu0 %v4036_v3  ;;  %3436 = vmatprep.subr.bf16.mxu1 %v3912_v1 }
  0x57   : > { %3018 = vmatprep.subr.bf16.mxu0 %v4044_v4  ;;  %3450 = vmatprep.mubr.msk.bf16.mxu1 %vm3913_vm0, %v3912_v1 }
  0x58   : > { %924 = vmatprep.mubr.bf16.mxu0 %v4197_v30 }
  0x59   : > { %3437 = vmatpush3.bf16.msra.mxu1 %v4051_v5 }
  0x5a   : > { %3019 = vmatpush3.bf16.msra.mxu0 %v4057_v6  ;;  %3438 = vmatprep.subr.bf16.mxu1 %v3912_v1 }
  0x5b   : > { %3020 = vmatprep.subr.bf16.mxu0 %v4062_v7 }
  0x5d   : > { %3439 = vmatpush3.bf16.msra.mxu1 %v4068_v8 }
  0x5e   : > { %3021 = vmatpush3.bf16.msra.mxu0 %v4075_v9  ;;  %3440 = vmatprep.subr.bf16.mxu1 %v3912_v1 }
  0x5f   : > { %3022 = vmatprep.subr.bf16.mxu0 %v4081_v10 }
  0x61   : > { %3441 = vmatpush3.bf16.msra.mxu1 %v4088_v11 }
  0x62   : > { %3023 = vmatpush3.bf16.msra.mxu0 %v4095_v12  ;;  %3442 = vmatprep.subr.bf16.mxu1 %v3912_v1 }
  0x63   : > { %3024 = vmatprep.subr.bf16.mxu0 %v4101_v13 }
  0x65   : > { %3443 = vmatpush3.bf16.msra.mxu1 %v4108_v14 }
  0x66   : > { %3025 = vmatpush3.bf16.msra.mxu0 %v4115_v15  ;;  %3444 = vmatprep.subr.bf16.mxu1 %v3912_v1 }
  0x67   : > { %3026 = vmatprep.subr.bf16.mxu0 %v4121_v16 }
  0x69   : > { %3445 = vmatpush3.bf16.msra.mxu1 %v4127_v17 }
  0x6a   : > { %3027 = vmatpush3.bf16.msra.mxu0 %v4134_v18  ;;  %3446 = vmatprep.subr.bf16.mxu1 %v3912_v1 }
  0x6b   : > { %3028 = vmatprep.subr.bf16.mxu0 %v4140_v19 }
  0x6d   : > { %3447 = vmatpush3.bf16.msra.mxu1 %v4151_v20 }
  0x6e   : > { %3029 = vmatpush3.bf16.msra.mxu0 %v4158_v21  ;;  %3448 = vmatprep.subr.bf16.mxu1 %v3912_v1 }
  0x6f   : > { %3030 = vmatprep.subr.bf16.mxu0 %v4163_v22 }
  0x71   : > { %3449 = vmatpush3.bf16.msra.mxu1 %v4172_v24 }
  0x72   : > { %3031 = vmatpush3.bf16.msra.mxu0 %v4181_v26  ;;  %3454 = vmatprep.subr.bf16.mxu1 %v3912_v1 }
  0x73   : > { %3047 = vmatprep.subr.bf16.mxu0 %v4195_v29 }
  0x74   : > { %3451 = vmatmul.mubr.bf16.vlgmr.msra.gmra.mxu1 %v4393_v56 }
  0x75   : > { %925 = vmatmul.mubr.bf16.vlgmr.msra.gmra.mxu0 %v4176_v25  ;;  %3455 = vmatpush3.bf16.msra.mxu1 %v4207_v32 }
  0x76   : > { %3048 = vmatpush3.bf16.msra.mxu0 %v4214_v33  ;;  %3456 = vmatprep.subr.bf16.mxu1 %v3912_v1 }
  0x77   : > { %3049 = vmatprep.subr.bf16.mxu0 %v4220_v34  ;;  %3470 = vmatprep.mubr.msk.bf16.mxu1 %vm3913_vm0, %v3912_v1 }
  0x78   : > { %1004 = vmatprep.mubr.bf16.mxu0 %v4197_v30 }
  0x79   : > { %3457 = vmatpush3.bf16.msra.mxu1 %v4228_v35 }
  0x7a   : > { %3050 = vmatpush3.bf16.msra.mxu0 %v4235_v36  ;;  %3458 = vmatprep.subr.bf16.mxu1 %v3912_v1 }
  0x7b   : > { %3051 = vmatprep.subr.bf16.mxu0 %v4241_v37 }
  0x7d   : > { %3459 = vmatpush3.bf16.msra.mxu1 %v4250_v38 }
  0x7e   : > { %3052 = vmatpush3.bf16.msra.mxu0 %v4257_v39  ;;  %3460 = vmatprep.subr.bf16.mxu1 %v3912_v1 }
  0x7f   : > { %3053 = vmatprep.subr.bf16.mxu0 %v4263_v40 }
  0x81   : > { %3461 = vmatpush3.bf16.msra.mxu1 %v4269_v41 }
  0x82   : > { %3054 = vmatpush3.bf16.msra.mxu0 %v4276_v42  ;;  %3462 = vmatprep.subr.bf16.mxu1 %v3912_v1 }
  0x83   : > { %3055 = vmatprep.subr.bf16.mxu0 %v4282_v43 }
  0x85   : > { %3463 = vmatpush3.bf16.msra.mxu1 %v4287_v44 }
  0x86   : > { %3056 = vmatpush3.bf16.msra.mxu0 %v4293_v45  ;;  %3464 = vmatprep.subr.bf16.mxu1 %v3912_v1 }
  0x87   : > { %3057 = vmatprep.subr.bf16.mxu0 %v4300_v46 }
  0x89   : > { %3465 = vmatpush3.bf16.msra.mxu1 %v4306_v47 }
  0x8a   : > { %3058 = vmatpush3.bf16.msra.mxu0 %v4311_v48  ;;  %3466 = vmatprep.subr.bf16.mxu1 %v3912_v1 }
  0x8b   : > { %3059 = vmatprep.subr.bf16.mxu0 %v4317_v49 }
  0x8d   : > { %3467 = vmatpush3.bf16.msra.mxu1 %v4325_v50 }
  0x8e   : > { %3060 = vmatpush3.bf16.msra.mxu0 %v4330_v51  ;;  %3468 = vmatprep.subr.bf16.mxu1 %v3912_v1 }
  0x8f   : > { %3061 = vmatprep.subr.bf16.mxu0 %v4336_v52 }
  0x91   : > { %3469 = vmatpush3.bf16.msra.mxu1 %v4344_v53 }
  0x92   : > { %3062 = vmatpush3.bf16.msra.mxu0 %v4349_v54  ;;  %3474 = vmatprep.subr.bf16.mxu1 %v3912_v1 }
  0x93   : > { %3078 = vmatprep.subr.bf16.mxu0 %v4022_v0  ;;  %v3837_v0 = vld [vmem:[%s5221_s1 + $0xb0] sm:$0xff]  }
  0x94   : > { %3471 = vmatmul.mubr.bf16.vlgmr.msra.gmra.mxu1 %v4393_v56 }
  0x95   : > { %1005 = vmatmul.mubr.bf16.vlgmr.msra.gmra.mxu0 %v4176_v25  ;;  %3475 = vmatpush3.bf16.msra.mxu1 %v4030_v2  ;;  %v3839_v2 = vld [vmem:[%s5221_s1 + $0x68] sm:$0xff]  }
  0x96   : > { %3079 = vmatpush3.bf16.msra.mxu0 %v4036_v3  ;;  %3476 = vmatprep.subr.bf16.mxu1 %v3912_v1  ;;  %v3840_v3 = vld [vmem:[%s5221_s1 + $0xa8] sm:$0xff]  }
  0x97   : > { %3080 = vmatprep.subr.bf16.mxu0 %v4044_v4  ;;  %3490 = vmatprep.mubr.msk.bf16.mxu1 %vm3913_vm0, %v3912_v1  ;;  %v3841_v4 = vld [vmem:[%s5221_s1 + $0x28] sm:$0xff]  }
  0x98   : > { %1096 = vmatprep.mubr.bf16.mxu0 %v4393_v56 }
  0x99   : > { %3477 = vmatpush3.bf16.msra.mxu1 %v4051_v5  ;;  %v3842_v5 = vld [vmem:[%s5221_s1 + $0x60] sm:$0xff]  }
  0x9a   : > { %3081 = vmatpush3.bf16.msra.mxu0 %v4057_v6  ;;  %3478 = vmatprep.subr.bf16.mxu1 %v3912_v1  ;;  %v3843_v6 = vld [vmem:[%s5221_s1 + $0xa0] sm:$0xff]  }
  0x9b   : > { %3082 = vmatprep.subr.bf16.mxu0 %v4062_v7  ;;  %v3844_v7 = vld [vmem:[%s5221_s1 + $0x20] sm:$0xff]  }
  0x9d   : > { %3479 = vmatpush3.bf16.msra.mxu1 %v4068_v8  ;;  %v3845_v8 = vld [vmem:[%s5221_s1 + $0x58] sm:$0xff]  }
  0x9e   : > { %3083 = vmatpush3.bf16.msra.mxu0 %v4075_v9  ;;  %3480 = vmatprep.subr.bf16.mxu1 %v3912_v1  ;;  %v3846_v9 = vld [vmem:[%s5221_s1 + $0x98] sm:$0xff]  }
  0x9f   : > { %3084 = vmatprep.subr.bf16.mxu0 %v4081_v10  ;;  %v3847_v10 = vld [vmem:[%s5221_s1 + $0x18] sm:$0xff]  }
  0xa1   : > { %3481 = vmatpush3.bf16.msra.mxu1 %v4088_v11  ;;  %v3848_v11 = vld [vmem:[%s5221_s1 + $0x50] sm:$0xff]  }
  0xa2   : > { %3085 = vmatpush3.bf16.msra.mxu0 %v4095_v12  ;;  %3482 = vmatprep.subr.bf16.mxu1 %v3912_v1  ;;  %v3838_v1 = vld [vmem:[%s5221_s1 + $0x30] sm:$0xff]  }
  0xa3   : > { %3086 = vmatprep.subr.bf16.mxu0 %v4101_v13  ;;  %v3849_v12 = vld [vmem:[%s5221_s1 + $0x90] sm:$0xff]   ;;  %v344_v13 = vrot.slane %v4166_v23, 1 }
  0xa5   : > { %3483 = vmatpush3.bf16.msra.mxu1 %v4108_v14  ;;  %v346_v14 = vpack.c.bf16 %v344_v13, %v344_v13 }
  0xa6   : > { %3087 = vmatpush3.bf16.msra.mxu0 %v4115_v15  ;;  %3484 = vmatprep.subr.bf16.mxu1 %v4459_v57 }
  0xa7   : > { %3088 = vmatprep.subr.bf16.mxu0 %v4121_v16 }
  0xa9   : > { %3485 = vmatpush3.bf16.msra.mxu1 %v4127_v17 }
  0xaa   : > { %3089 = vmatpush3.bf16.msra.mxu0 %v4134_v18  ;;  %3486 = vmatprep.subr.bf16.mxu1 %v4459_v57 }
  0xab   : > { %3090 = vmatprep.subr.bf16.mxu0 %v4140_v19 }
  0xad   : > { %3487 = vmatpush3.bf16.msra.mxu1 %v4151_v20 }
  0xae   : > { %3091 = vmatpush3.bf16.msra.mxu0 %v4158_v21  ;;  %3488 = vmatprep.subr.bf16.mxu1 %v4459_v57 }
  0xaf   : > { %3092 = vmatprep.subr.bf16.mxu0 %v4163_v22 }
  0xb1   : > { %3489 = vmatpush3.bf16.msra.mxu1 %v4172_v24 }
  0xb2   : > { %3093 = vmatpush3.bf16.msra.mxu0 %v4181_v26  ;;  %3494 = vmatprep.subr.bf16.mxu1 %v4459_v57 }
  0xb3   : > { %3109 = vmatprep.subr.bf16.mxu0 %v4195_v29 }
  0xb4   : > { %3491 = vmatmul.mubr.bf16.vlgmr.msra.gmra.mxu1 %v4472_v59 }
  0xb5   : > { %1097 = vmatmul.mubr.bf16.vlgmr.msra.gmra.mxu0 %v4197_v30  ;;  %3495 = vmatpush3.bf16.msra.mxu1 %v4207_v32 }
  0xb6   : > { %3110 = vmatpush3.bf16.msra.mxu0 %v4214_v33  ;;  %3496 = vmatprep.subr.bf16.mxu1 %v4459_v57 }
  0xb7   : > { %3111 = vmatprep.subr.bf16.mxu0 %v4220_v34  ;;  %3510 = vmatprep.mubr.msk.bf16.mxu1 %vm3913_vm0, %v4459_v57 }
  0xb8   : > { %1176 = vmatprep.mubr.bf16.mxu0 %v4393_v56 }
  0xb9   : > { %3497 = vmatpush3.bf16.msra.mxu1 %v4228_v35 }
  0xba   : > { %3112 = vmatpush3.bf16.msra.mxu0 %v4235_v36  ;;  %3498 = vmatprep.subr.bf16.mxu1 %v4459_v57 }
  0xbb   : > { %3113 = vmatprep.subr.bf16.mxu0 %v4241_v37 }
  0xbd   : > { %3499 = vmatpush3.bf16.msra.mxu1 %v4250_v38 }
  0xbe   : > { %3114 = vmatpush3.bf16.msra.mxu0 %v4257_v39  ;;  %3500 = vmatprep.subr.bf16.mxu1 %v4459_v57 }
  0xbf   : > { %3115 = vmatprep.subr.bf16.mxu0 %v4263_v40 }
  0xc1   : > { %3501 = vmatpush3.bf16.msra.mxu1 %v4269_v41 }
  0xc2   : > { %3116 = vmatpush3.bf16.msra.mxu0 %v4276_v42  ;;  %3502 = vmatprep.subr.bf16.mxu1 %v4459_v57 }
  0xc3   : > { %3117 = vmatprep.subr.bf16.mxu0 %v4282_v43 }
  0xc5   : > { %3503 = vmatpush3.bf16.msra.mxu1 %v4287_v44 }
  0xc6   : > { %3118 = vmatpush3.bf16.msra.mxu0 %v4293_v45  ;;  %3504 = vmatprep.subr.bf16.mxu1 %v4459_v57 }
  0xc7   : > { %3119 = vmatprep.subr.bf16.mxu0 %v4300_v46 }
  0xc9   : > { %3505 = vmatpush3.bf16.msra.mxu1 %v4306_v47 }
  0xca   : > { %3120 = vmatpush3.bf16.msra.mxu0 %v4311_v48  ;;  %3506 = vmatprep.subr.bf16.mxu1 %v4459_v57 }
  0xcb   : > { %3121 = vmatprep.subr.bf16.mxu0 %v4317_v49 }
  0xcd   : > { %3507 = vmatpush3.bf16.msra.mxu1 %v4325_v50 }
  0xce   : > { %3122 = vmatpush3.bf16.msra.mxu0 %v4330_v51  ;;  %3508 = vmatprep.subr.bf16.mxu1 %v4459_v57 }
  0xcf   : > { %3123 = vmatprep.subr.bf16.mxu0 %v4336_v52 }
  0xd1   : > { %3509 = vmatpush3.bf16.msra.mxu1 %v4344_v53 }
  0xd2   : > { %3124 = vmatpush3.bf16.msra.mxu0 %v4349_v54  ;;  %3514 = vmatprep.subr.bf16.mxu1 %v4459_v57 }
  0xd3   : > { %3140 = vmatprep.subr.bf16.mxu0 %v3833_v60  ;;  %v4681_v60 = vld [vmem:[%s5224_s4 + $0xa8] sm:$0xff]  }
  0xd4   : > { %3511 = vmatmul.mubr.bf16.vlgmr.msra.gmra.mxu1 %v4472_v59 }
  0xd5   : > { %1177 = vmatmul.mubr.bf16.vlgmr.msra.gmra.mxu0 %v4197_v30  ;;  %3515 = vmatpush3.bf16.msra.mxu1 %v3834_v61 }
  0xd6   : > { %3141 = vmatpush3.bf16.msra.mxu0 %v3835_v62  ;;  %3516 = vmatprep.subr.bf16.mxu1 %v4459_v57  ;;  %v4686_v62 = vld [vmem:[%s5224_s4 + $0x60] sm:$0xff]  }
  0xd7   : > { %3142 = vmatprep.subr.bf16.mxu0 %v3836_v63  ;;  %3530 = vmatprep.mubr.msk.bf16.mxu1 %vm3913_vm0, %v4459_v57 }
  0xd8   : > { %1257 = vmatprep.mubr.bf16.mxu0 %v4472_v59 }
  0xd9   : > { %3517 = vmatpush3.bf16.msra.mxu1 %v3837_v0 }
  0xda   : > { %3143 = vmatpush3.bf16.msra.mxu0 %v3838_v1  ;;  %3518 = vmatprep.subr.bf16.mxu1 %v4459_v57 }
  0xdb   : > { %3144 = vmatprep.subr.bf16.mxu0 %v3839_v2  ;;  %v4692_v2 = vld [vmem:[%s5224_s4 + $0x20] sm:$0xff]  }
  0xdd   : > { %3519 = vmatpush3.bf16.msra.mxu1 %v3840_v3 }
  0xde   : > { %3145 = vmatpush3.bf16.msra.mxu0 %v3841_v4  ;;  %3520 = vmatprep.subr.bf16.mxu1 %v4459_v57 }
  0xdf   : > { %3146 = vmatprep.subr.bf16.mxu0 %v3842_v5  ;;  %v4700_v5 = vld [vmem:[%s5224_s4 + $0xa0] sm:$0xff]  }
  0xe1   : > { %3521 = vmatpush3.bf16.msra.mxu1 %v3843_v6  ;;  %v4705_v6 = vld [vmem:[%s5223_s3] ss:$0 sm:$0xff] }
  0xe2   : > { %3147 = vmatpush3.bf16.msra.mxu0 %v3844_v7  ;;  %3522 = vmatprep.subr.bf16.mxu1 %v4459_v57  ;;  %v4710_v7 = vld [vmem:[%s5224_s4 + $0x58] sm:$0xff]  }
  0xe3   : > { %3148 = vmatprep.subr.bf16.mxu0 %v3845_v8 }
  0xe5   : > { %3523 = vmatpush3.bf16.msra.mxu1 %v3846_v9  ;;  %v4716_v9 = vld [vmem:[%s5224_s4 + $0x18] sm:$0xff]  }
  0xe6   : > { %3149 = vmatpush3.bf16.msra.mxu0 %v3847_v10  ;;  %3524 = vmatprep.subr.bf16.mxu1 %v4459_v57 }
  0xe7   : > { %3150 = vmatprep.subr.bf16.mxu0 %v3848_v11  ;;  %v4725_v11 = vld [vmem:[%s5224_s4 + $0x98] sm:$0xff]  }
  0xe9   : > { %3525 = vmatpush3.bf16.msra.mxu1 %v3849_v12  ;;  %v4730_v12 = vld [vmem:[%s5224_s4 + $0x50] sm:$0xff]  }
  0xea   : > { %3151 = vmatpush3.bf16.msra.mxu0 %v4134_v18  ;;  %3526 = vmatprep.subr.bf16.mxu1 %v4459_v57 }
  0xeb   : > { %3152 = vmatprep.subr.bf16.mxu0 %v4140_v19 }
  0xed   : > { %3527 = vmatpush3.bf16.msra.mxu1 %v4151_v20 }
  0xee   : > { %3153 = vmatpush3.bf16.msra.mxu0 %v4158_v21  ;;  %3528 = vmatprep.subr.bf16.mxu1 %v4459_v57 }
  0xef   : > { %3154 = vmatprep.subr.bf16.mxu0 %v4163_v22 }
  0xf1   : > { %3529 = vmatpush3.bf16.msra.mxu1 %v4172_v24 }
  0xf2   : > { %3155 = vmatpush3.bf16.msra.mxu0 %v4181_v26  ;;  %3534 = vmatprep.subr.bf16.mxu1 %v4459_v57 }
  0xf3   : > { %3171 = vmatprep.subr.bf16.mxu0 %v4195_v29 }
  0xf4   : > { %v613_v15 = vpop.f32.mrf.mxu1  ;;  %3531 = vmatmul.mubr.bf16.vlgmr.msra.gmra.mxu1 %v346_v14 }
  0xf5   : > { %v2970_v16 = vpop.f32.mrf.mxu0  ;;  %1258 = vmatmul.mubr.bf16.vlgmr.msra.gmra.mxu0 %v4393_v56  ;;  %3535 = vmatpush3.bf16.msra.mxu1 %v4207_v32 }
  0xf6   : > { %v3412_v17 = vpop.f32.mrf.mxu1  ;;  %3172 = vmatpush3.bf16.msra.mxu0 %v4214_v33  ;;  %3536 = vmatprep.subr.bf16.mxu1 %v4459_v57 }
  0xf7   : > { %v2971_v18 = vpop.f32.mrf.mxu0  ;;  %3173 = vmatprep.subr.bf16.mxu0 %v4220_v34  ;;  %3550 = vmatprep.mubr.msk.bf16.mxu1 %vm3913_vm0, %v4459_v57  ;;  %v4749_v17 = vld [vmem:[%s5224_s4 + $0x48] sm:$0xff]  }
  0xf8   : > { %v2972_v19 = vadd.f32 %v2971_v18, %v2970_v16  ;;  %v616_v20 = vpop.f32.mrf.mxu1  ;;  %1337 = vmatprep.mubr.bf16.mxu0 %v4472_v59  ;;  %v4744_v16 = vld [vmem:[%s5224_s4 + $0x90] sm:$0xff]   ;;  %v4756_v18 = vld [vmem:[%s5224_s4 + $0x8] sm:$0xff]  }
  0xf9   : > { %v2973_v21 = vpop.f32.mrf.mxu0  ;;  %3537 = vmatpush3.bf16.msra.mxu1 %v4228_v35  ;;  %v4766_v20 = vld [vmem:[%s5224_s4 + $0x40] sm:$0xff]  }
  0xfa   : > { %v4596_v22 = vadd.f32 %v2972_v19, %v613_v15  ;;  %v3413_v23 = vpop.f32.mrf.mxu1  ;;  %3174 = vmatpush3.bf16.msra.mxu0 %v4235_v36  ;;  %3538 = vmatprep.subr.bf16.mxu1 %v4459_v57  ;;  %v4761_v19 = vld [vmem:[%s5224_s4 + $0x88] sm:$0xff]   ;;  %v4774_v21 = vld [vmem:[%s5224_s4] sm:$0xff]  }
  0xfb   : > { %v2974_v24 = vpop.f32.mrf.mxu0  ;;  %3175 = vmatprep.subr.bf16.mxu0 %v4241_v37  ;;  %v4786_v23 = vld [vmem:[%s5224_s4 + $0x80] sm:$0xff]  }
  0xfd   : > { %3539 = vmatpush3.bf16.msra.mxu1 %v4250_v38 }
  0xfe   : > { %3176 = vmatpush3.bf16.msra.mxu0 %v4257_v39  ;;  %3540 = vmatprep.subr.bf16.mxu1 %v4459_v57 }
  0xff   : > { %3177 = vmatprep.subr.bf16.mxu0 %v4263_v40 }
 0x101   : > { %3541 = vmatpush3.bf16.msra.mxu1 %v4269_v41 }
 0x102   : > { %3178 = vmatpush3.bf16.msra.mxu0 %v4276_v42  ;;  %3542 = vmatprep.subr.bf16.mxu1 %v4459_v57 }
 0x103   : > { %3179 = vmatprep.subr.bf16.mxu0 %v4282_v43 }
 0x105   : > { %3543 = vmatpush3.bf16.msra.mxu1 %v4287_v44  ;;  %v4631_v44 = vld [vmem:[%s5224_s4 + $0x78] sm:$0xff]  }
 0x106   : > { %3180 = vmatpush3.bf16.msra.mxu0 %v4293_v45  ;;  %3544 = vmatprep.subr.bf16.mxu1 %v4459_v57  ;;  %v4636_v45 = vld [vmem:[%s5224_s4 + $0x38] sm:$0xff]  }
 0x107   : > { %3181 = vmatprep.subr.bf16.mxu0 %v4300_v46  ;;  %v4641_v46 = vld [vmem:[%s5224_s4 + $0xb8] sm:$0xff]  }
 0x109   : > { %3545 = vmatpush3.bf16.msra.mxu1 %v4306_v47  ;;  %v4646_v47 = vld [vmem:[%s5224_s4 + $0x70] sm:$0xff]  }
 0x10a   : > { %3182 = vmatpush3.bf16.msra.mxu0 %v4311_v48  ;;  %3546 = vmatprep.subr.bf16.mxu1 %v4459_v57  ;;  %v4656_v48 = vld [vmem:[%s5224_s4 + $0x30] sm:$0xff]  }
 0x10b   : > { %3183 = vmatprep.subr.bf16.mxu0 %v4317_v49 }
 0x10d   : > { %3547 = vmatpush3.bf16.msra.mxu1 %v4325_v50  ;;  %v4662_v50 = vld [vmem:[%s5224_s4 + $0xb0] sm:$0xff]  }
 0x10e   : > { %3184 = vmatpush3.bf16.msra.mxu0 %v4330_v51  ;;  %3548 = vmatprep.subr.bf16.mxu1 %v4459_v57 }
 0x10f   : > { %3185 = vmatprep.subr.bf16.mxu0 %v4336_v52  ;;  %v4667_v52 = vld [vmem:[%s5224_s4 + $0x68] sm:$0xff]  }
 0x111   : > { %3549 = vmatpush3.bf16.msra.mxu1 %v4344_v53 }
 0x112   : > { %3186 = vmatpush3.bf16.msra.mxu0 %v4349_v54  ;;  %3554 = vmatprep.subr.bf16.mxu1 %v4459_v57 }
 0x113   : > { %3202 = vmatprep.subr.bf16.mxu0 %v4631_v44 }
 0x114   : > { %v885_v25 = vpop.f32.mrf.mxu1  ;;  %3551 = vmatmul.mubr.bf16.vlgmr.msra.gmra.mxu1 %v346_v14  ;;  %v4736_v14 = vld [vmem:[%s5224_s4 + $0x10] sm:$0xff]  }
 0x115   : > { %v3001_v26 = vpop.f32.mrf.mxu0  ;;  %1338 = vmatmul.mubr.bf16.vlgmr.msra.gmra.mxu0 %v4393_v56  ;;  %3570 = vmatprep.mubr.msk.bf16.mxu1 %vm3913_vm0, %v4459_v57 }
 0x116   : > { %v3432_v27 = vpop.f32.mrf.mxu1  ;;  %3555 = vmatpush3.bf16.msra.mxu1 %v4641_v46  ;;  %3203 = vmatpush3.bf16.msra.mxu0 %v4636_v45 }
 0x117   : > { %v3002_v28 = vpop.f32.mrf.mxu0  ;;  %3556 = vmatprep.subr.bf16.mxu1 %v4459_v57  ;;  %3204 = vmatprep.subr.bf16.mxu0 %v4646_v47 }
 0x118   : > { %v3003_v29 = vadd.f32 %v3002_v28, %v3001_v26  ;;  %v888_v30 = vpop.f32.mrf.mxu1 }
 0x119   : > { %v3004_v31 = vpop.f32.mrf.mxu0 }
 0x11a   : > { %v886_v32 = vadd.f32 %v3003_v29, %v885_v25  ;;  %v3433_v33 = vpop.f32.mrf.mxu1  ;;  %3205 = vmatpush3.bf16.msra.mxu0 %v4656_v48  ;;  %3557 = vmatpush3.bf16.msra.mxu1 %v4662_v50 }
 0x11b   : > { %v3005_v34 = vpop.f32.mrf.mxu0  ;;  %3206 = vmatprep.subr.bf16.mxu0 %v4667_v52  ;;  %3558 = vmatprep.subr.bf16.mxu1 %v4459_v57 }
 0x11c   : > { %v891_v35 = vmax.f32 %v4596_v22, %v886_v32  ;;  %v4780_v22 = vld [vmem:[%s5225_s5 + $0x78] sm:$0xff]  }
 0x11e   : > { %3207 = vmatpush3.bf16.msra.mxu0 %v4673_v55  ;;  %3559 = vmatpush3.bf16.msra.mxu1 %v4681_v60 }
 0x11f   : > { %3208 = vmatprep.subr.bf16.mxu0 %v4686_v62  ;;  %3560 = vmatprep.subr.bf16.mxu1 %v4459_v57 }
 0x122   : > { %3209 = vmatpush3.bf16.msra.mxu0 %v4692_v2  ;;  %3561 = vmatpush3.bf16.msra.mxu1 %v4700_v5 }
 0x123   : > { %3210 = vmatprep.subr.bf16.mxu0 %v4710_v7  ;;  %3562 = vmatprep.subr.bf16.mxu1 %v4459_v57 }
 0x126   : > { %3211 = vmatpush3.bf16.msra.mxu0 %v4716_v9  ;;  %3563 = vmatpush3.bf16.msra.mxu1 %v4725_v11 }
 0x127   : > { %3212 = vmatprep.subr.bf16.mxu0 %v4730_v12  ;;  %3564 = vmatprep.subr.bf16.mxu1 %v4459_v57 }
 0x12a   : > { %3213 = vmatpush3.bf16.msra.mxu0 %v4736_v14  ;;  %3565 = vmatpush3.bf16.msra.mxu1 %v4744_v16 }
 0x12b   : > { %3214 = vmatprep.subr.bf16.mxu0 %v4749_v17  ;;  %3566 = vmatprep.subr.bf16.mxu1 %v4459_v57 }
 0x12e   : > { %3215 = vmatpush3.bf16.msra.mxu0 %v4756_v18  ;;  %3567 = vmatpush3.bf16.msra.mxu1 %v4761_v19 }
 0x12f   : > { %3216 = vmatprep.subr.bf16.mxu0 %v4766_v20  ;;  %3568 = vmatprep.subr.bf16.mxu1 %v4459_v57 }
 0x132   : > { %3217 = vmatpush3.bf16.msra.mxu0 %v4774_v21  ;;  %3569 = vmatpush3.bf16.msra.mxu1 %v4786_v23 }
 0x133   : > { %3233 = vmatprep.subr.bf16.mxu0 %v4780_v22  ;;  %3574 = vmatprep.subr.bf16.mxu1 %v4459_v57 }
 0x134   : > { %v966_v36 = vpop.f32.mrf.mxu1 }
 0x135   : > { %v3032_v37 = vpop.f32.mrf.mxu0 }
 0x136   : > { %v3452_v38 = vpop.f32.mrf.mxu1 }
 0x137   : > { %v3033_v39 = vpop.f32.mrf.mxu0 }
 0x138   : > { %v969_v40 = vpop.f32.mrf.mxu1  ;;  %v3034_v53 = vadd.f32 %v3033_v39, %v3032_v37 }
 0x139   : > { %v3035_v41 = vpop.f32.mrf.mxu0 }
 0x13a   : > { %v3453_v42 = vpop.f32.mrf.mxu1  ;;  %v967_v63 = vadd.f32 %v3034_v53, %v966_v36 }
 0x13b   : > { %v3036_v43 = vpop.f32.mrf.mxu0 }
 0x154   : > { %v1046_v49 = vpop.f32.mrf.mxu1 }
 0x155   : > { %v3063_v51 = vpop.f32.mrf.mxu0 }
 0x156   : > { %v3472_v54 = vpop.f32.mrf.mxu1 }
 0x157   : > { %v3064_v56 = vpop.f32.mrf.mxu0 }
 0x158   : > { %v3065_v58 = vadd.f32 %v3064_v56, %v3063_v51  ;;  %v1049_v59 = vpop.f32.mrf.mxu1 }
 0x159   : > { %v3066_v61 = vpop.f32.mrf.mxu0 }
 0x15a   : > { %v1047_v0 = vadd.f32 %v3065_v58, %v1046_v49  ;;  %v3473_v1 = vpop.f32.mrf.mxu1 }
 0x15b   : > { %v3067_v3 = vpop.f32.mrf.mxu0 }
 0x15c   : > { %v1052_v4 = vmax.f32 %v967_v63, %v1047_v0 }
 0x15e   : > { %v1053_v8 = vmax.f32 %v891_v35, %v1052_v4 }
 0x160   : > { %v1061_v10 = vadd.f32 %v4705_v6, %v1053_v8 }
 0x162   : > { %v1062_v13 = vmax.f32 %v1061_v10, 0.0 }
 0x164   : > { %v1063_v15 = vmin.f32 %v1062_v13, 6.0 }
 0x166   : > { %1394 = vst.msk [vmem:[#allocation3] sm:$0x7f] %vm1392_vm1, %v1063_v15 }
 0x16d   : > { %v4790_v24 = vld [vmem:[#allocation3] sm:$0xff] }
 0x16e   : > { %v4795_v25 = vpack.c.bf16 %v4790_v24, %v4790_v24 }
 0x170   : > { %1631 = vmatprep.mubr.bf16.mxu0 %v4795_v25 }
 0x174   : > { %v1138_v26 = vpop.f32.mrf.mxu1 }
 0x175   : > { %v3094_v27 = vpop.f32.mrf.mxu0 }
 0x176   : > { %v3492_v28 = vpop.f32.mrf.mxu1 }
 0x177   : > { %v3095_v29 = vpop.f32.mrf.mxu0 }
 0x178   : > { %v3096_v30 = vadd.f32 %v3095_v29, %v3094_v27  ;;  %v1141_v31 = vpop.f32.mrf.mxu1 }
 0x179   : > { %v3097_v32 = vpop.f32.mrf.mxu0 }
 0x17a   : > { %v1139_v33 = vadd.f32 %v3096_v30, %v1138_v26  ;;  %v3493_v34 = vpop.f32.mrf.mxu1 }
 0x17b   : > { %v3098_v35 = vpop.f32.mrf.mxu0 }
 0x194   : > { %v1218_v36 = vpop.f32.mrf.mxu1 }
 0x195   : > { %v3125_v37 = vpop.f32.mrf.mxu0 }
 0x196   : > { %v3512_v38 = vpop.f32.mrf.mxu1 }
 0x197   : > { %v3126_v39 = vpop.f32.mrf.mxu0  ;;  %v4805_v38 = vld [vmem:[%s5225_s5 + $0x38] sm:$0xff]  }
 0x198   : > { %v3127_v40 = vadd.f32 %v3126_v39, %v3125_v37  ;;  %v1221_v41 = vpop.f32.mrf.mxu1 }
 0x199   : > { %v3128_v42 = vpop.f32.mrf.mxu0  ;;  %v4810_v41 = vld [vmem:[%s5225_s5 + $0x70] sm:$0xff]  }
 0x19a   : > { %v1219_v43 = vadd.f32 %v3127_v40, %v1218_v36  ;;  %v3513_v49 = vpop.f32.mrf.mxu1 }
 0x19b   : > { %v3129_v51 = vpop.f32.mrf.mxu0  ;;  %v4831_v49 = vld [vmem:[%s5225_s5 + $0x68] sm:$0xff]  }
 0x19c   : > { %v1224_v53 = vmax.f32 %v1139_v33, %v1219_v43  ;;  %v4824_v43 = vld [vmem:[%s5225_s5 + $0x30] sm:$0xff]  }
 0x19d   : > { %v4837_v51 = vld [vmem:[%s5225_s5 + $0xb0] sm:$0xff]  }
 0x1b4   : > { %v1299_v54 = vpop.f32.mrf.mxu1 }
 0x1b5   : > { %v3156_v56 = vpop.f32.mrf.mxu0 }
 0x1b6   : > { %v3532_v58 = vpop.f32.mrf.mxu1 }
 0x1b7   : > { %v3157_v59 = vpop.f32.mrf.mxu0  ;;  %v4865_v58 = vld [vmem:[%s5225_s5 + $0x20] sm:$0xff]  }
 0x1b8   : > { %v1302_v61 = vpop.f32.mrf.mxu1  ;;  %v3158_v8 = vadd.f32 %v3157_v59, %v3156_v56  ;;  %v4858_v56 = vld [vmem:[%s5225_s5 + $0xa8] sm:$0xff]   ;;  %v4871_v59 = vld [vmem:[%s5225_s5 + $0x58] sm:$0xff]  }
 0x1b9   : > { %v3159_v63 = vpop.f32.mrf.mxu0  ;;  %v4877_v61 = vld [vmem:[%s5225_s5 + $0xa0] sm:$0xff]  }
 0x1ba   : > { %v3533_v0 = vpop.f32.mrf.mxu1  ;;  %v1300_v28 = vadd.f32 %v3158_v8, %v1299_v54  ;;  %v4852_v54 = vld [vmem:[%s5225_s5 + $0x60] sm:$0xff]   ;;  %v4884_v63 = vld [vmem:[%s5225_s5 + $0x18] sm:$0xff]   ;;  %v4915_v8 = vld [vmem:[%s5225_s5 + $0x90] sm:$0xff]  }
 0x1bb   : > { %v3160_v1 = vpop.f32.mrf.mxu0  ;;  %v4890_v0 = vld [vmem:[%s5225_s5 + $0x50] sm:$0xff]  }
 0x1bc   : > { %v4896_v1 = vld [vmem:[%s5225_s5 + $0x98] sm:$0xff]  }
 0x1d4   : > { %v1379_v3 = vpop.f32.mrf.mxu1 }
 0x1d5   : > { %v3187_v4 = vpop.f32.mrf.mxu0 }
 0x1d6   : > { %v3552_v10 = vpop.f32.mrf.mxu1 }
 0x1d7   : > { %v3188_v13 = vpop.f32.mrf.mxu0  ;;  %v4922_v10 = vld [vmem:[%s5225_s5 + $0x8] sm:$0xff]  }
 0x1d8   : > { %v3189_v15 = vadd.f32 %v3188_v13, %v3187_v4  ;;  %v1382_v26 = vpop.f32.mrf.mxu1  ;;  %v4909_v4 = vld [vmem:[%s5225_s5 + $0x48] sm:$0xff]   ;;  %v4928_v13 = vld [vmem:[%s5225_s5 + $0x40] sm:$0xff]  }
 0x1d9   : > { %v3190_v27 = vpop.f32.mrf.mxu0  ;;  %v4941_v26 = vld [vmem:[%s5225_s5] sm:$0xff]  }
 0x1da   : > { %v1380_v29 = vadd.f32 %v3189_v15, %v1379_v3  ;;  %v3553_v30 = vpop.f32.mrf.mxu1  ;;  %v4903_v3 = vld [vmem:[%s5225_s5 + $0x10] sm:$0xff]   ;;  %v4934_v15 = vld [vmem:[%s5225_s5 + $0x88] sm:$0xff]   ;;  %v4948_v27 = vld [vmem:[%s5225_s5 + $0x80] sm:$0xff]  }
 0x1db   : > { %v3191_v31 = vpop.f32.mrf.mxu0  ;;  %v3801_v30 = vld [vmem:[%s5227_s7 + $0xd8] sm:$0xff]  }
 0x1dc   : > { %v1385_v32 = vmax.f32 %v1300_v28, %v1380_v29  ;;  %v3798_v28 = vld [vmem:[%s5227_s7 + $0xa0] sm:$0xff]   ;;  %v3799_v29 = vld [vmem:[%s5227_s7 + $0x58] sm:$0xff]  }
 0x1dd   : > { %v3800_v31 = vld [vmem:[%s5227_s7 + $0x18] sm:$0xff]  }
 0x1de   : > { %v1386_v33 = vmax.f32 %v1224_v53, %v1385_v32  ;;  %v4846_v53 = vld [vmem:[%s5225_s5 + $0x28] sm:$0xff]   ;;  %v3802_v32 = vld [vmem:[%s5227_s7 + $0x98] sm:$0xff]  }
 0x1e0   : > { %v1387_v34 = vadd.f32 %v4705_v6, %v1386_v33  ;;  %v4815_v6 = vld [vmem:[%s5225_s5 + $0xb8] sm:$0xff]   ;;  %v3803_v33 = vld [vmem:[%s5227_s7 + $0x50] sm:$0xff]  }
 0x1e2   : > { %v1388_v35 = vmax.f32 %v1387_v34, 0.0  ;;  %v3805_v34 = vld [vmem:[%s5227_s7 + $0xd0] sm:$0xff]  }
 0x1e4   : > { %v1389_v36 = vmin.f32 %v1388_v35, 6.0  ;;  %v3804_v35 = vld [vmem:[%s5227_s7 + $0x10] sm:$0xff]  }
 0x1e6   : > { %1393 = vst.msk [vmem:[#allocation2 + $0x1] sm:$0x7f] %vm1392_vm1, %v1389_v36  ;;  %v3806_v36 = vld [vmem:[%s5227_s7 + $0x90] sm:$0xff]  }
 0x1ed   : > { %v1395_v37 = vld [vmem:[#allocation2] sm:$0xff] }
 0x1ee   : > { %v1400_v39 = vpack.c.bf16 %v1395_v37, %v1395_v37  ;;  %v1398_v40 = vrot.slane %v1395_v37, 1  ;;  %v3807_v37 = vld [vmem:[%s5227_s7 + $0x48] sm:$0xff]  }
 0x1f0   : > { %1632 = vmatmul.mubr.bf16.vlgmr.msra.gmra.mxu0 %v1400_v39  ;;  %v4817_v42 = vpack.c.bf16 %v1398_v40, %v1398_v40  ;;  %v3810_v40 = vld [vmem:[%s5227_s7 + $0x88] sm:$0xff]  }
 0x1f1   : > { %3234 = vmatpush3.bf16.msra.mxu0 %v4805_v38  ;;  %1903 = vmatprep.mubr.bf16.mxu0 %v4795_v25 }
 0x1f2   : > { %3571 = vmatmul.mubr.bf16.vlgmr.msra.gmra.mxu1 %v4817_v42  ;;  %3235 = vmatprep.subr.bf16.mxu0 %v4810_v41 }
 0x1f3   : > { %3575 = vmatpush3.bf16.msra.mxu1 %v4815_v6  ;;  %3590 = vmatprep.mubr.msk.bf16.mxu1 %vm3913_vm0, %v4459_v57 }
 0x1f4   : > { %3576 = vmatprep.subr.bf16.mxu1 %v4459_v57 }
 0x1f5   : > { %3236 = vmatpush3.bf16.msra.mxu0 %v4824_v43 }
 0x1f6   : > { %3237 = vmatprep.subr.bf16.mxu0 %v4831_v49 }
 0x1f7   : > { %3577 = vmatpush3.bf16.msra.mxu1 %v4837_v51 }
 0x1f8   : > { %3578 = vmatprep.subr.bf16.mxu1 %v4459_v57 }
 0x1f9   : > { %3238 = vmatpush3.bf16.msra.mxu0 %v4846_v53 }
 0x1fa   : > { %3239 = vmatprep.subr.bf16.mxu0 %v4852_v54 }
 0x1fb   : > { %3579 = vmatpush3.bf16.msra.mxu1 %v4858_v56 }
 0x1fc   : > { %3580 = vmatprep.subr.bf16.mxu1 %v4459_v57 }
 0x1fd   : > { %3240 = vmatpush3.bf16.msra.mxu0 %v4865_v58 }
 0x1fe   : > { %3241 = vmatprep.subr.bf16.mxu0 %v4871_v59 }
 0x1ff   : > { %3581 = vmatpush3.bf16.msra.mxu1 %v4877_v61 }
 0x200   : > { %3582 = vmatprep.subr.bf16.mxu1 %v4459_v57 }
 0x201   : > { %3242 = vmatpush3.bf16.msra.mxu0 %v4884_v63 }
 0x202   : > { %3243 = vmatprep.subr.bf16.mxu0 %v4890_v0 }
 0x203   : > { %3583 = vmatpush3.bf16.msra.mxu1 %v4896_v1 }
 0x204   : > { %3584 = vmatprep.subr.bf16.mxu1 %v4459_v57 }
 0x205   : > { %3244 = vmatpush3.bf16.msra.mxu0 %v4903_v3 }
 0x206   : > { %3245 = vmatprep.subr.bf16.mxu0 %v4909_v4 }
 0x207   : > { %3585 = vmatpush3.bf16.msra.mxu1 %v4915_v8 }
 0x208   : > { %3586 = vmatprep.subr.bf16.mxu1 %v4459_v57 }
 0x209   : > { %3246 = vmatpush3.bf16.msra.mxu0 %v4922_v10 }
 0x20a   : > { %3247 = vmatprep.subr.bf16.mxu0 %v4928_v13 }
 0x20b   : > { %3587 = vmatpush3.bf16.msra.mxu1 %v4934_v15 }
 0x20c   : > { %3588 = vmatprep.subr.bf16.mxu1 %v4459_v57 }
 0x20d   : > { %3248 = vmatpush3.bf16.msra.mxu0 %v4941_v26 }
 0x20e   : > { %3264 = vmatprep.subr.bf16.mxu0 %v4631_v44  ;;  %v1404_v44 = vrot.slane %v4790_v24, 1 }
 0x20f   : > { %3589 = vmatpush3.bf16.msra.mxu1 %v4948_v27 }
 0x210   : > { %1904 = vmatmul.mubr.bf16.vlgmr.msra.gmra.mxu0 %v1400_v39  ;;  %3594 = vmatprep.subr.bf16.mxu1 %v4459_v57  ;;  %v3808_v39 = vld [vmem:[%s5227_s7 + $0x8] sm:$0xff]  }
 0x211   : > { %3265 = vmatpush3.bf16.msra.mxu0 %v4636_v45  ;;  %1984 = vmatprep.mubr.bf16.mxu0 %v4817_v42  ;;  %v1406_v45 = vpack.c.bf16 %v1404_v44, %v1404_v44 }
 0x212   : > { %3591 = vmatmul.mubr.bf16.vlgmr.msra.gmra.mxu1 %v4817_v42  ;;  %3266 = vmatprep.subr.bf16.mxu0 %v4646_v47  ;;  %v3784_v47 = vld [vmem:[%s5227_s7 + $0x38] sm:$0xff]  }
 0x213   : > { %3595 = vmatpush3.bf16.msra.mxu1 %v4641_v46  ;;  %3610 = vmatprep.mubr.msk.bf16.mxu1 %vm3913_vm0, %v4459_v57  ;;  %v3783_v46 = vld [vmem:[%s5227_s7 + $0x78] sm:$0xff]  }
 0x214   : > { %3596 = vmatprep.subr.bf16.mxu1 %v4459_v57 }
 0x215   : > { %3267 = vmatpush3.bf16.msra.mxu0 %v4656_v48  ;;  %v3785_v48 = vld [vmem:[%s5227_s7 + $0xf8] sm:$0xff]  }
 0x216   : > { %3268 = vmatprep.subr.bf16.mxu0 %v4667_v52  ;;  %v3787_v52 = vld [vmem:[%s5227_s7 + $0x70] sm:$0xff]  }
 0x217   : > { %3597 = vmatpush3.bf16.msra.mxu1 %v4662_v50  ;;  %v3786_v50 = vld [vmem:[%s5227_s7 + $0xb8] sm:$0xff]  }
 0x218   : > { %3598 = vmatprep.subr.bf16.mxu1 %v4459_v57 }
 0x219   : > { %3269 = vmatpush3.bf16.msra.mxu0 %v4673_v55  ;;  %v3789_v55 = vld [vmem:[%s5227_s7 + $0xf0] sm:$0xff]  }
 0x21a   : > { %3270 = vmatprep.subr.bf16.mxu0 %v4686_v62  ;;  %v3788_v62 = vld [vmem:[%s5227_s7 + $0x30] sm:$0xff]  }
 0x21b   : > { %3599 = vmatpush3.bf16.msra.mxu1 %v4681_v60 }
 0x21c   : > { %3600 = vmatprep.subr.bf16.mxu1 %v4459_v57 }
 0x21d   : > { %3271 = vmatpush3.bf16.msra.mxu0 %v4692_v2  ;;  %v3790_v2 = vld [vmem:[%s5227_s7 + $0xb0] sm:$0xff]  }
 0x21e   : > { %3272 = vmatprep.subr.bf16.mxu0 %v4710_v7  ;;  %v3793_v7 = vld [vmem:[%s5227_s7 + $0xe8] sm:$0xff]  }
 0x21f   : > { %3601 = vmatpush3.bf16.msra.mxu1 %v4700_v5  ;;  %v3791_v5 = vld [vmem:[%s5227_s7 + $0x68] sm:$0xff]  }
 0x220   : > { %3602 = vmatprep.subr.bf16.mxu1 %v4459_v57 }
 0x221   : > { %3273 = vmatpush3.bf16.msra.mxu0 %v4716_v9 }
 0x222   : > { %3274 = vmatprep.subr.bf16.mxu0 %v4730_v12 }
 0x223   : > { %3603 = vmatpush3.bf16.msra.mxu1 %v4725_v11 }
 0x224   : > { %3604 = vmatprep.subr.bf16.mxu1 %v4459_v57 }
 0x225   : > { %3275 = vmatpush3.bf16.msra.mxu0 %v4736_v14 }
 0x226   : > { %3276 = vmatprep.subr.bf16.mxu0 %v4749_v17  ;;  %v3792_v17 = vld [vmem:[%s5227_s7 + $0x28] sm:$0xff]  }
 0x227   : > { %3605 = vmatpush3.bf16.msra.mxu1 %v4744_v16 }
 0x228   : > { %3606 = vmatprep.subr.bf16.mxu1 %v4459_v57 }
 0x229   : > { %3277 = vmatpush3.bf16.msra.mxu0 %v4756_v18  ;;  %v3794_v18 = vld [vmem:[%s5227_s7 + $0xa8] sm:$0xff]  }
 0x22a   : > { %3278 = vmatprep.subr.bf16.mxu0 %v4766_v20  ;;  %v3795_v20 = vld [vmem:[%s5227_s7 + $0x60] sm:$0xff]  }
 0x22b   : > { %3607 = vmatpush3.bf16.msra.mxu1 %v4761_v19 }
 0x22c   : > { %3608 = vmatprep.subr.bf16.mxu1 %v4459_v57 }
 0x22d   : > { %3279 = vmatpush3.bf16.msra.mxu0 %v4774_v21  ;;  %v3797_v21 = vld [vmem:[%s5227_s7 + $0xe0] sm:$0xff]  }
 0x22e   : > { %3295 = vmatprep.subr.bf16.mxu0 %v4780_v22 }
 0x22f   : > { %3609 = vmatpush3.bf16.msra.mxu1 %v4786_v23 }
 0x230   : > { %1985 = vmatmul.mubr.bf16.vlgmr.msra.gmra.mxu0 %v4795_v25  ;;  %3614 = vmatprep.subr.bf16.mxu1 %v4459_v57 }
 0x231   : > { %3296 = vmatpush3.bf16.msra.mxu0 %v4805_v38  ;;  %2064 = vmatprep.mubr.bf16.mxu0 %v4817_v42  ;;  %v3809_v38 = vld [vmem:[%s5227_s7 + $0xc8] sm:$0xff]  }
 0x232   : > { %3611 = vmatmul.mubr.bf16.vlgmr.msra.gmra.mxu1 %v1406_v45  ;;  %3297 = vmatprep.subr.bf16.mxu0 %v4810_v41 }
 0x233   : > { %3615 = vmatpush3.bf16.msra.mxu1 %v4815_v6  ;;  %3630 = vmatprep.mubr.msk.bf16.mxu1 %vm3913_vm0, %v4459_v57 }
 0x234   : > { %3616 = vmatprep.subr.bf16.mxu1 %v4459_v57 }
 0x235   : > { %3298 = vmatpush3.bf16.msra.mxu0 %v4824_v43 }
 0x236   : > { %3299 = vmatprep.subr.bf16.mxu0 %v4831_v49 }
 0x237   : > { %3617 = vmatpush3.bf16.msra.mxu1 %v4837_v51 }
 0x238   : > { %3618 = vmatprep.subr.bf16.mxu1 %v4459_v57 }
 0x239   : > { %3300 = vmatpush3.bf16.msra.mxu0 %v4846_v53 }
 0x23a   : > { %3301 = vmatprep.subr.bf16.mxu0 %v4852_v54 }
 0x23b   : > { %3619 = vmatpush3.bf16.msra.mxu1 %v4858_v56 }
 0x23c   : > { %3620 = vmatprep.subr.bf16.mxu1 %v4459_v57 }
 0x23d   : > { %3302 = vmatpush3.bf16.msra.mxu0 %v4865_v58 }
 0x23e   : > { %3303 = vmatprep.subr.bf16.mxu0 %v4871_v59 }
 0x23f   : > { %3621 = vmatpush3.bf16.msra.mxu1 %v4877_v61 }
 0x240   : > { %3622 = vmatprep.subr.bf16.mxu1 %v4459_v57 }
 0x241   : > { %3304 = vmatpush3.bf16.msra.mxu0 %v4884_v63 }
 0x242   : > { %3305 = vmatprep.subr.bf16.mxu0 %v4890_v0 }
 0x243   : > { %3623 = vmatpush3.bf16.msra.mxu1 %v4896_v1 }
 0x244   : > { %3624 = vmatprep.subr.bf16.mxu1 %v4459_v57 }
 0x245   : > { %3306 = vmatpush3.bf16.msra.mxu0 %v4903_v3 }
 0x246   : > { %3307 = vmatprep.subr.bf16.mxu0 %v4909_v4 }
 0x247   : > { %3625 = vmatpush3.bf16.msra.mxu1 %v4915_v8 }
 0x248   : > { %3626 = vmatprep.subr.bf16.mxu1 %v4459_v57 }
 0x249   : > { %3308 = vmatpush3.bf16.msra.mxu0 %v4922_v10 }
 0x24a   : > { %3309 = vmatprep.subr.bf16.mxu0 %v4928_v13 }
 0x24b   : > { %3627 = vmatpush3.bf16.msra.mxu1 %v4934_v15 }
 0x24c   : > { %3628 = vmatprep.subr.bf16.mxu1 %v4459_v57 }
 0x24d   : > { %3310 = vmatpush3.bf16.msra.mxu0 %v4941_v26 }
 0x24e   : > { %3326 = vmatprep.subr.bf16.mxu0 %v3783_v46 }
 0x24f   : > { %3629 = vmatpush3.bf16.msra.mxu1 %v4948_v27 }
 0x250   : > { %2065 = vmatmul.mubr.bf16.vlgmr.msra.gmra.mxu0 %v4795_v25  ;;  %3348 = vmatprep.subr.bf16.mxu1 %v3785_v48  ;;  %v3796_v25 = vld [vmem:[%s5227_s7 + $0x20] sm:$0xff]  }
 0x251   : > { %3327 = vmatpush3.bf16.msra.mxu0 %v3784_v47 }
 0x252   : > { %3631 = vmatmul.mubr.bf16.vlgmr.msra.gmra.mxu1 %v1406_v45  ;;  %3328 = vmatprep.subr.bf16.mxu0 %v3787_v52 }
 0x253   : > { %3349 = vmatpush3.bf16.msra.mxu1 %v3786_v50 }
 0x254   : > { %3350 = vmatprep.subr.bf16.mxu1 %v3789_v55 }
 0x255   : > { %3329 = vmatpush3.bf16.msra.mxu0 %v3788_v62  ;;  %v3811_v62 = vld [vmem:[%s5227_s7 + $0x40] sm:$0xff]  }
 0x256   : > { %3330 = vmatprep.subr.bf16.mxu0 %v3791_v5  ;;  %v3812_v5 = vld [vmem:[%s5227_s7] sm:$0xff]  }
 0x257   : > { %3351 = vmatpush3.bf16.msra.mxu1 %v3790_v2 }
 0x258   : > { %3352 = vmatprep.subr.bf16.mxu1 %v3793_v7  ;;  %v3813_v7 = vld [vmem:[%s5227_s7 + $0xc0] sm:$0xff]  }
 0x259   : > { %3331 = vmatpush3.bf16.msra.mxu0 %v3792_v17 }
 0x25a   : > { %3332 = vmatprep.subr.bf16.mxu0 %v3795_v20 }
 0x25b   : > { %3353 = vmatpush3.bf16.msra.mxu1 %v3794_v18 }
 0x25c   : > { %3354 = vmatprep.subr.bf16.mxu1 %v3797_v21 }
 0x25d   : > { %3333 = vmatpush3.bf16.msra.mxu0 %v3796_v25 }
 0x25e   : > { %3334 = vmatprep.subr.bf16.mxu0 %v3799_v29 }
 0x25f   : > { %3355 = vmatpush3.bf16.msra.mxu1 %v3798_v28 }
 0x260   : > { %3356 = vmatprep.subr.bf16.mxu1 %v3801_v30 }
 0x261   : > { %3335 = vmatpush3.bf16.msra.mxu0 %v3800_v31  ;;  %v3816_v31 = vld [vmem:[%s5227_s7 + $0x138] sm:$0xff]  }
 0x262   : > { %3336 = vmatprep.subr.bf16.mxu0 %v3803_v33 }
 0x263   : > { %3357 = vmatpush3.bf16.msra.mxu1 %v3802_v32  ;;  %v3819_v32 = vld [vmem:[%s5227_s7 + $0x180] sm:$0xff]  }
 0x264   : > { %3358 = vmatprep.subr.bf16.mxu1 %v3805_v34 }
 0x265   : > { %3337 = vmatpush3.bf16.msra.mxu0 %v3804_v35 }
 0x266   : > { %3338 = vmatprep.subr.bf16.mxu0 %v3807_v37 }
 0x267   : > { %3359 = vmatpush3.bf16.msra.mxu1 %v3806_v36  ;;  %v3817_v36 = vld [vmem:[%s5227_s7 + $0x170] sm:$0xff]  }
 0x268   : > { %3360 = vmatprep.subr.bf16.mxu1 %v3809_v38 }
 0x269   : > { %3339 = vmatpush3.bf16.msra.mxu0 %v3808_v39 }
 0x26a   : > { %3340 = vmatprep.subr.bf16.mxu0 %v3811_v62 }
 0x26b   : > { %3361 = vmatpush3.bf16.msra.mxu1 %v3810_v40  ;;  %v3818_v40 = vld [vmem:[%s5227_s7 + $0x130] sm:$0xff]  }
 0x26c   : > { %3362 = vmatprep.subr.bf16.mxu1 %v3813_v7 }
 0x26d   : > { %3341 = vmatpush3.bf16.msra.mxu0 %v3812_v5 }
 0x2b0   : > { %v3218_v60 = vpop.f32.mrf.mxu0 }
 0x2b2   : > { %v3219_v9 = vpop.f32.mrf.mxu0  ;;  %v1673_v11 = vpop.f32.mrf.mxu1 }
 0x2b3   : > { %v3220_v12 = vadd.f32 %v3219_v9, %v3218_v60  ;;  %v2899_v60 = vld [vmem:[%s5226_s6] ss:$0 sm:$0xff] }
 0x2b4   : > { %v3221_v14 = vpop.f32.mrf.mxu0  ;;  %v3572_v16 = vpop.f32.mrf.mxu1  ;;  %v3814_v9 = vld [vmem:[%s5227_s7 + $0x80] sm:$0xff]  }
 0x2b5   : > { %v5063_v19 = vadd.f32 %v3220_v12, %v1673_v11  ;;  %3363 = vmatpush3.bf16.msra.mxu1 %v3814_v9  ;;  %v3815_v14 = vld [vmem:[%s5227_s7 + $0x178] sm:$0xff]  }
 0x2b6   : > { %v3222_v22 = vpop.f32.mrf.mxu0  ;;  %v1676_v23 = vpop.f32.mrf.mxu1  ;;  %3634 = vmatprep.subr.bf16.mxu1 %v4459_v57  ;;  %3370 = vmatprep.subr.bf16.mxu0 %v3815_v14 }
 0x2b8   : > { %v3573_v24 = vpop.f32.mrf.mxu1 }
 0x2d0   : > { %v3249_v41 = vpop.f32.mrf.mxu0 }
 0x2d2   : > { %v3250_v6 = vpop.f32.mrf.mxu0  ;;  %v1945_v42 = vpop.f32.mrf.mxu1 }
 0x2d3   : > { %v3251_v43 = vadd.f32 %v3250_v6, %v3249_v41  ;;  %v3820_v6 = vld [vmem:[%s5227_s7 + $0x168] sm:$0xff]  }
 0x2d4   : > { %v3252_v49 = vpop.f32.mrf.mxu0  ;;  %v3592_v51 = vpop.f32.mrf.mxu1 }
 0x2d5   : > { %v1946_v53 = vadd.f32 %v3251_v43, %v1945_v42  ;;  %v3821_v42 = vld [vmem:[%s5227_s7 + $0x128] sm:$0xff]   ;;  %v3822_v43 = vld [vmem:[%s5227_s7 + $0x160] sm:$0xff]   ;;  %v3825_v51 = vld [vmem:[%s5227_s7 + $0x118] sm:$0xff]  }
 0x2d6   : > { %v3253_v54 = vpop.f32.mrf.mxu0  ;;  %v1948_v56 = vpop.f32.mrf.mxu1  ;;  %v3823_v49 = vld [vmem:[%s5227_s7 + $0x120] sm:$0xff]  }
 0x2d7   : > { %v1951_v58 = vmax.f32 %v5063_v19, %v1946_v53  ;;  %v3826_v53 = vld [vmem:[%s5227_s7 + $0x150] sm:$0xff]   ;;  %v3828_v56 = vld [vmem:[%s5227_s7 + $0x148] sm:$0xff]  }
 0x2d8   : > { %v3593_v59 = vpop.f32.mrf.mxu1  ;;  %v3827_v54 = vld [vmem:[%s5227_s7 + $0x110] sm:$0xff]  }
 0x2d9   : > { %v3830_v59 = vld [vmem:[%s5227_s7 + $0x140] sm:$0xff]  }
 0x2f0   : > { %v3280_v61 = vpop.f32.mrf.mxu0 }
 0x2f2   : > { %v3281_v63 = vpop.f32.mrf.mxu0  ;;  %v2026_v0 = vpop.f32.mrf.mxu1 }
 0x2f3   : > { %v3282_v15 = vadd.f32 %v3281_v63, %v3280_v61  ;;  %v3831_v61 = vld [vmem:[%s5227_s7 + $0x100] sm:$0xff]  }
 0x2f4   : > { %v3283_v1 = vpop.f32.mrf.mxu0  ;;  %v3612_v3 = vpop.f32.mrf.mxu1 }
 0x2f5   : > { %v2027_v47 = vadd.f32 %v3282_v15, %v2026_v0 }
 0x2f6   : > { %v3284_v4 = vpop.f32.mrf.mxu0  ;;  %v2029_v8 = vpop.f32.mrf.mxu1 }
 0x2f8   : > { %v3613_v10 = vpop.f32.mrf.mxu1 }
 0x310   : > { %v3311_v13 = vpop.f32.mrf.mxu0 }
 0x312   : > { %v3312_v26 = vpop.f32.mrf.mxu0  ;;  %v2106_v27 = vpop.f32.mrf.mxu1 }
 0x313   : > { %v3313_v44 = vadd.f32 %v3312_v26, %v3311_v13 }
 0x314   : > { %v3314_v45 = vpop.f32.mrf.mxu0  ;;  %v3632_v46 = vpop.f32.mrf.mxu1 }
 0x315   : > { %v2107_v48 = vadd.f32 %v3313_v44, %v2106_v27 }
 0x316   : > { %v3315_v50 = vpop.f32.mrf.mxu0  ;;  %v2109_v52 = vpop.f32.mrf.mxu1 }
 0x317   : > { %v2112_v55 = vmax.f32 %v2027_v47, %v2107_v48  ;;  %v2268_v47 = vld [vmem:[%s5228_s8] sm:$0x1] }
 0x318   : > { %v3633_v2 = vpop.f32.mrf.mxu1 }
 0x319   : > { %v2113_v11 = vmax.f32 %v1951_v58, %v2112_v55  ;;  %v3829_v58 = vld [vmem:[%s5227_s7 + $0x108] sm:$0xff]  }
 0x31b   : > { %v2121_v12 = vadd.f32 %v2899_v60, %v2113_v11 }
 0x31d   : > { %v2122_v16 = vmax.f32 %v2121_v12, 0.0 }
 0x31f   : > { %v2123_v17 = vmin.f32 %v2122_v16, 6.0 }
 0x321   : > { %v2124_v18 = vpack.c.bf16 %v2123_v17, %v2123_v17 }
 0x323   : > { %v2137_v19 = vrot.slane %v2124_v18, 2  ;;  %v2126_v20 = vshrl.u32 %v2124_v18, 16  ;;  %v2131_v21 = vrot.slane %v2124_v18, 1  ;;  %v2143_v24 = vrot.slane %v2124_v18, 3 }
 0x325   : > { %2138 = vrot.lane.b32.xlu1 %v2137_v19, %s3914_s26  ;;  %2128 = vrot.lane.b32.xlu0 %v2126_v20, %s3915_s28  ;;  %v2134_v22 = vrot.slane %v2126_v20, 1  ;;  %v2140_v23 = vrot.slane %v2126_v20, 2  ;;  %s3920_s28 = smov [#allocation4]  }
 0x329   : > { %2132 = vrot.lane.b32.xlu0 %v2131_v21, %s3916_s29  ;;  %2135 = vrot.lane.b32.xlu1 %v2134_v22, %s3917_s16 }
 0x32d   : > { %2141 = vrot.lane.b32.xlu0 %v2140_v23, %s3918_s27  ;;  %2144 = vrot.lane.b32.xlu1 %v2143_v24, %s3919_s17  ;;  %s323_s27 = sand.u32 1, %s3902_s10   ;;  %s2950_s17 = sshll.u32 %s3992_s13, 4 }
 0x32e   : > { %s324_s14 = scalar_lea.vmem [#allocation4], %s323_s27  ;;  %s2739_s23 = scalar_lea.hbm %s5229_s9, %s2950_s17 }
 0x32f   : > { %s2741_s21 = sshll.u32 %s324_s14, 4  ;;  %s2729_s25 = scalar_lea.sflag [#allocation5], %s323_s27  ;;  %s2742_s21 = int_to_ptr.vmem [resolvable:$true] %s2741_s21 }
 0x330   : > { %s3850_s26 = scalar_lea.vmem %s2742_s21, 16  ;;  %s3854_s13 = sshll.u32 %s3920_s28, 4  ;;  %s3855_s13 = int_to_ptr.vmem [resolvable:$false] %s3854_s13 }
 0x331   : > { %p3851_p11 = scmp.ne.s32.totalorder %s2742_s21, %s3850_s26  ;;  %s3856_s29 = scalar_lea.vmem %s3855_s13, 32 }
 0x332   : > { %p3857_p0 = scmp.lt.s32.totalorder %s2742_s21, %s3855_s13  ;;  %p3858_p1 = scmp.lt.s32.totalorder %s3856_s29, %s3850_s26 }
 0x333   : > { %p3852_p12 = pnand %p3851_p11, %p4009_p5 }
 0x334   : > { %p3859_p2 = por %p3858_p1, %p3857_p0 }
 0x335   : > { %p3853_p13 = pneg %p3852_p12 }
 0x337   : > { %p3860_p3 = pnand %p3859_p2, %p3853_p13 }
 0x397   : > { %v2139_v25 = vpop.permute.xlu1 %2138  ;;  %v2129_v28 = vpop.permute.xlu0 %2128 }
 0x398   : > { %v2148_v37 = vsel %vm2146_vm5, %v2124_v18, %v2129_v28 }
 0x39b   : > { %v2133_v29 = vpop.permute.xlu0 %2132  ;;  %v2136_v30 = vpop.permute.xlu1 %2135 }
 0x39c   : > { %v2156_v33 = vsel %vm2154_vm2, %v2133_v29, %v2136_v30  ;;  %v2152_v34 = vsel %vm2150_vm3, %v2129_v28, %v2133_v29  ;;  %v2160_v35 = vsel %vm2158_vm4, %v2136_v30, %v2139_v25 }
 0x39d   : > { %2598 = vmatprep.mubr.bf16.mxu0 %v2152_v34  ;;  %2638 = vmatprep.mubr.bf16.mxu1 %v2160_v35 }
 0x39e   : > { %2599 = vmatmul.mubr.bf16.vlgmr.msra.gmra.mxu0 %v2148_v37  ;;  %2639 = vmatmul.mubr.bf16.vlgmr.msra.gmra.mxu1 %v2156_v33 }
 0x39f   : > { %3371 = vmatpush3.bf16.msra.mxu0 %v3816_v31  ;;  %v2142_v38 = vpop.permute.xlu0 %2141  ;;  %v2145_v39 = vpop.permute.xlu1 %2144  ;;  %3635 = vmatpush3.bf16.msra.mxu1 %v3819_v32 }
 0x3a0   : > { %3372 = vmatprep.subr.bf16.mxu0 %v3817_v36  ;;  %v2168_v41 = vsel %vm2166_vm6, %v2142_v38, %v2145_v39  ;;  %3636 = vmatprep.mubr.msk.bf16.mxu1 %vm3913_vm0, %v4459_v57  ;;  %v3824_v57 = vld [vmem:[%s5227_s7 + $0x158] sm:$0xff]   ;;  %v2164_v63 = vsel %vm2162_vm8, %v2139_v25, %v2142_v38 }
 0x3a1   : > { %2678 = vmatprep.mubr.bf16.mxu0 %v2168_v41 }
 0x3a3   : > { %3373 = vmatpush3.bf16.msra.mxu0 %v3818_v40 }
 0x3a4   : > { %3374 = vmatprep.subr.bf16.mxu0 %v3820_v6 }
 0x3a6   : > { %3637 = vmatmul.mubr.msk.bf16.vlgmr.msra.gmra.mxu1 %vm2563_vm7, %v2145_v39 }
 0x3a7   : > { %3375 = vmatpush3.bf16.msra.mxu0 %v3821_v42 }
 0x3a8   : > { %3376 = vmatprep.subr.bf16.mxu0 %v3822_v43 }
 0x3ab   : > { %3377 = vmatpush3.bf16.msra.mxu0 %v3823_v49 }
 0x3ac   : > { %3378 = vmatprep.subr.bf16.mxu0 %v3824_v57 }
 0x3af   : > { %3379 = vmatpush3.bf16.msra.mxu0 %v3825_v51 }
 0x3b0   : > { %3380 = vmatprep.subr.bf16.mxu0 %v3826_v53 }
 0x3b3   : > { %3381 = vmatpush3.bf16.msra.mxu0 %v3827_v54 }
 0x3b4   : > { %3382 = vmatprep.subr.bf16.mxu0 %v3828_v56 }
 0x3b7   : > { %3383 = vmatpush3.bf16.msra.mxu0 %v3829_v58 }
 0x3b8   : > { %3384 = vmatprep.subr.bf16.mxu0 %v3830_v59 }
 0x3bb   : > { %3385 = vmatpush3.bf16.msra.mxu0 %v3831_v61 }
 0x3be   : > { %2679 = vmatmul.mubr.bf16.vlgmr.msra.gmra.mxu0 %v2164_v63 }
 0x45e   : > { %v3342_v0 = vpop.f32.mrf.mxu0  ;;  %v3364_v1 = vpop.f32.mrf.mxu1 }
 0x460   : > { %v3343_v3 = vpop.f32.mrf.mxu0  ;;  %v3365_v4 = vpop.f32.mrf.mxu1 }
 0x461   : > { %v3344_v46 = vadd.f32 %v3343_v3, %v3342_v0  ;;  %v3366_v52 = vadd.f32 %v3365_v4, %v3364_v1 }
 0x462   : > { %v3345_v8 = vpop.f32.mrf.mxu0  ;;  %v3367_v10 = vpop.f32.mrf.mxu1 }
 0x463   : > { %v2601_v48 = vadd.f32 %v3344_v46, %v2268_v47 }
 0x464   : > { %v3346_v13 = vpop.f32.mrf.mxu0  ;;  %v3368_v15 = vpop.f32.mrf.mxu1 }
 0x465   : > { %v2641_v60 = vadd.f32 %v3366_v52, %v2601_v48 }
 0x466   : > { %v2720_v26 = vpop.f32.mrf.mxu1 }
 0x468   : > { %v3638_v27 = vpop.f32.mrf.mxu1 }
 0x46a   : > { %v2723_v44 = vpop.f32.mrf.mxu1 }
 0x46c   : > { %v3639_v45 = vpop.f32.mrf.mxu1 }
 0x47e   : > { %v3386_v50 = vpop.f32.mrf.mxu0 }
 0x480   : > { %v3387_v55 = vpop.f32.mrf.mxu0 }
 0x481   : > { %v3388_v62 = vadd.f32 %v3387_v55, %v3386_v50 }
 0x482   : > { %v3389_v2 = vpop.f32.mrf.mxu0 }
 0x483   : > { %v2681_v5 = vadd.f32 %v3388_v62, %v2641_v60 }
 0x484   : > { %v3390_v7 = vpop.f32.mrf.mxu0 }
 0x485   : > { %v2721_v9 = vadd.f32 %v2720_v26, %v2681_v5 }
 0x487   : > { %2727 = vst.msk [vmem:[%s324_s14] sm:$0x1] %vm2726_vm9, %v2721_v9 }
 0x488   : > { %3863 = shalt.err (!%p3860_p3)
}
 0x489   : > { %s3864_s16 = scalar_lea.hbm %s2739_s23, 16  ;;  %s3868_s14 = scalar_lea.hbm %s5229_s9, 32 }
 0x48a   : > { %p3865_p4 = scmp.ne.s32.totalorder %s2739_s23, %s3864_s16  ;;  %p3869_p9 = scmp.lt.s32.totalorder %s2739_s23, %s5229_s9 }
 0x48b   : > { %p3870_p10 = scmp.lt.s32.totalorder %s3868_s14, %s3864_s16 }
 0x48c   : > { %p3866_p7 = pnand %p3865_p4, %p4009_p5 }
 0x48d   : > { %p3871_p11 = por %p3870_p10, %p3869_p9 }
 0x48e   : > { %p3867_p8 = pneg %p3866_p7 }
 0x490   : > { %p3872_p12 = pnand %p3871_p11, %p3867_p8 }
 0x492   : > { %3875 = shalt.err (!%p3872_p12)
}
 0x493   : > { %3640 = dma.vmem_to_hbm [thread:$0]  (%p4009_p5), %s2742_s21, 16, %s2739_s23, %s2729_s25  }
 0x494 PF: > { %p3646_p13 = scmp.ge.s32.totalorder %s3910_s12, 2  ;;  %s2753_s26 = sand.u32 1, %s3898_s30  }
 0x495   : > { %s2754_s28 = scalar_lea.sflag [#allocation5], %s2753_s26 }
 0x496   : > { %p3643_p0 = pnand %p3646_p13, %p4013_p6 }
 0x498   : > { %p3644_p1 = pneg %p3643_p0 }
 0x49a   : > { %3893 = dma.done.wait (%p3644_p1), %s2754_s28, 16  }
 0x49b   : > { %3895 = vsyncadd (%p3644_p1), %s2754_s28, 4294967280  ;;  %p19_p2 = scmp.ge.s32.totalorder %s3996_s15, 4   ;;  %s5232_s30 = smov %s3902_s10 }
 0x49c   : > { %s5233_s10 = smov %s3906_s11  ;;  %s5234_s11 = smov %s4007_s18 }
 0x49d   : > { %s5235_s12 = smov %s3996_s15  ;;  %21 = sbr.rel (!%p19_p2) target bundleno = 3 (0x3), region = 91 }
 0x4a2   :  { %2758 = vsyncpa [#allocation5], 1 }
 0x4a3   :  { %2760 = vsyncpa [#allocation5 + $0x1], 1 }

</bundles_post_ra>
